<compile_context>
chip_gen: v5e
topology: v5e:2x2
jax: 0.10.0
libtpu: 0.0.40
codegen_flags: <defaults>
</compile_context>

<pallas_src>
import jax
import jax.numpy as jnp
from jax.experimental import pallas as pl
from jax.experimental.pallas import tpu as pltpu


def nsp_head_kernel(e_ref, w1_ref, b1_ref, w2_ref, b2_ref, o_ref):
    # e_ref : (Bt, S, H) VMEM (source dtype)   w1_ref : (H, 1) VMEM f32
    # w2_ref: (S, 1) VMEM f32                  b1_ref/b2_ref : (1,) SMEM f32
    # o_ref : (Bt, 1) VMEM f32
    bt, s, h = e_ref.shape

    # ---- Stage 1: out1 pre-activation — H-contraction on the MXU ----------
    # (Bt, S, H) -> (Bt*S, H) merges leading dims only (S % 8 == 0): free.
    e2 = e_ref[...].reshape(bt * s, h)                 # native dtype (bf16 stays bf16)
    w1 = w1_ref[...].astype(e2.dtype)                  # (H, 1) column
    s1 = jnp.dot(e2, w1, preferred_element_type=jnp.float32)   # (Bt*S, 1), MXU
    t = jnp.tanh(s1 + b1_ref[0])                       # (Bt*S, 1), EUP, f32

    # ---- Stage 2: out2 — tiny S-contraction (128x less work) on the VPU ---
    u = t.reshape(bt, s, 1) * w2_ref[...]              # (Bt,S,1) * (S,1) broadcast
    o = jnp.sum(u, axis=1) + b2_ref[0]                 # (Bt, 1)
    o_ref[...] = o.astype(o_ref.dtype)


def _effective_batch_tile(B, bt):
    """Clamp the requested tile to B; if it is smaller than B keep it a
    multiple of 8 so the (bt, 1) output block stays sublane-aligned."""
    bt = max(1, min(int(bt), B))
    if bt == B or bt % 8 == 0:
        return bt
    return min(B, ((bt + 7) // 8) * 8)


def nsp_lin_head(embedded, w1, b1, w2, b2, *, bt=16):
    """out2(tanh(out1(embedded).squeeze())) with out1: H->1, out2: 512->1.

    embedded : (B, S, H) f32 or bf16 (kept in its source dtype through the DMA)
    w1 : (1, H), b1 : (1,)   — PyTorch nn.Linear(H, 1) layout
    w2 : (1, S), b2 : (1,)   — PyTorch nn.Linear(512, 1) layout
    returns  : (B, 1) f32

    bt: batch tile. Default 16 (<=4 MiB f32 block, double-buffered) fits the
    default scoped VMEM on v5e/v6e/v7x. Sweep bt=32/64 on v6e (128 MiB VMEM);
    keep bt<=32 on v7x (64 MiB per-TC VMEM) and prefer a grid of >=2 steps so
    the parallel batch axis shards across its two TensorCores.
    """
    B, S, H = embedded.shape
    bt = _effective_batch_tile(B, bt)
    grid = pl.cdiv(B, bt)   # ragged B -> partial last block, masked by Pallas

    # Parameters as resident VMEM column vectors / SMEM scalars (f32).
    w1c = jnp.asarray(w1, jnp.float32).reshape(H, 1)
    w2c = jnp.asarray(w2, jnp.float32).reshape(S, 1)
    b1v = jnp.asarray(b1, jnp.float32).reshape(1)
    b2v = jnp.asarray(b2, jnp.float32).reshape(1)

    itemsize = jnp.dtype(embedded.dtype).itemsize
    block_bytes = bt * S * H * itemsize
    # Double-buffered input + headroom for f32 intermediates; capped at 64 MiB
    # so any config that compiles also fits v7x's per-TC VMEM.
    vmem_limit = int(min(max(32 << 20, 3 * block_bytes + (8 << 20)), 64 << 20))

    cost = pl.CostEstimate(
        flops=int(2 * B * S * (H + 1)),
        transcendentals=int(B * S),
        bytes_accessed=int(B * S * H * itemsize + 4 * (H + S + 2 + B)),
    )

    return pl.pallas_call(
        nsp_head_kernel,
        out_shape=jax.ShapeDtypeStruct((B, 1), jnp.float32),
        grid_spec=pltpu.PrefetchScalarGridSpec(
            num_scalar_prefetch=0,
            grid=(grid,),
            in_specs=[
                pl.BlockSpec((bt, S, H), lambda i: (i, 0, 0)),       # embedded tile
                pl.BlockSpec((H, 1), lambda i: (0, 0)),              # w1 column (resident)
                pl.BlockSpec(memory_space=pltpu.MemorySpace.SMEM),   # b1 scalar
                pl.BlockSpec((S, 1), lambda i: (0, 0)),              # w2 column (resident)
                pl.BlockSpec(memory_space=pltpu.MemorySpace.SMEM),   # b2 scalar
            ],
            out_specs=pl.BlockSpec((bt, 1), lambda i: (i, 0)),
        ),
        compiler_params=pltpu.CompilerParams(
            dimension_semantics=("parallel",),    # batch tiles are independent
            vmem_limit_bytes=vmem_limit,
        ),
        cost_estimate=cost,
    )(embedded, w1c, b1v, w2c, b2v)


def _reference(embedded, w1, b1, w2, b2):
    # Pure-JAX reference of the PyTorch forward (post-ALBERT). Uses the
    # elementwise multiply+sum path in f32 so it is independent of MXU
    # matmul precision.
    e = embedded.astype(jnp.float32)
    o1 = jnp.tanh(jnp.sum(e * jnp.reshape(w1, (1, 1, -1)), axis=-1) + b1[0])      # (B, S)
    o2 = jnp.sum(o1 * jnp.reshape(w2, (1, -1)), axis=-1, keepdims=True) + b2[0]   # (B, 1)
    return o2


if __name__ == "__main__":
    S, H = 512, 128   # seq fixed by nn.Linear(512, 1); H = albert hidden_size stand-in

    key = jax.random.PRNGKey(0)
    k_e1, k_e2, k_w1, k_b1, k_w2, k_b2 = jax.random.split(key, 6)

    # Parameters in PyTorch nn.Linear layout: weight (1, in), bias (1,).
    w1 = jax.random.normal(k_w1, (1, H), dtype=jnp.float32) * 0.05
    b1 = jax.random.normal(k_b1, (1,), dtype=jnp.float32) * 0.05
    w2 = jax.random.normal(k_w2, (1, S), dtype=jnp.float32) * 0.05
    b2 = jax.random.normal(k_b2, (1,), dtype=jnp.float32) * 0.05

    # --- Case 1: small f32 batch (single block) ----------------------------
    B1 = 2
    e1 = jax.random.normal(k_e1, (B1, S, H), dtype=jnp.float32)
    out1 = jax.block_until_ready(nsp_lin_head(e1, w1, b1, w2, b2))
    ref1 = _reference(e1, w1, b1, w2, b2)
    assert out1.shape == (B1, 1), out1.shape
    # Tolerance covers MXU f32 (multi-pass bf16) vs VPU-f32 reference rounding.
    assert jnp.allclose(out1, ref1, atol=5e-3, rtol=5e-3), (
        float(jnp.max(jnp.abs(out1 - ref1))))

    # --- Case 2: bf16 input, B not divisible by the tile -------------------
    # Exercises cdiv grid, partial last block masking and the bf16 MXU path.
    B2 = 20
    e2 = (jax.random.normal(k_e2, (B2, S, H), dtype=jnp.float32)
          .astype(jnp.bfloat16))
    out2 = jax.block_until_ready(nsp_lin_head(e2, w1, b1, w2, b2, bt=8))
    ref2 = _reference(e2, w1, b1, w2, b2)
    assert out2.shape == (B2, 1), out2.shape
    assert jnp.allclose(out2, ref2, atol=2e-2, rtol=2e-2), (
        float(jnp.max(jnp.abs(out2 - ref2))))

    print("KERNEL_OK")
</pallas_src>

<mosaic_0001>
module attributes {stable_mosaic.version = 11 : i64} {
  func.func @nsp_head_kernel(%arg0: i32, %arg1: memref<2x512x128xf32, #tpu.memory_space<vmem>>, %arg2: memref<128x1xf32, #tpu.memory_space<vmem>>, %arg3: memref<1xf32, #tpu.memory_space<smem>>, %arg4: memref<512x1xf32, #tpu.memory_space<vmem>>, %arg5: memref<1xf32, #tpu.memory_space<smem>>, %arg6: memref<2x1xf32, #tpu.memory_space<vmem>>) attributes {dimension_semantics = [#tpu.dimension_semantics<parallel>], iteration_bounds = array<i64: 1>, scalar_prefetch = 0 : i64, scratch_operands = 0 : i64, tpu.core_type = #tpu.core_type<tc>, window_params = [{transform_indices = @transform_0, window_bounds = array<i64: 2, 512, 128>}, {pipeline_mode = #tpu.pipeline_mode<synchronous>, transform_indices = @transform_1, window_bounds = array<i64: 128, 1>}, {transform_indices = @transform_2, window_bounds = array<i64: 1>}, {pipeline_mode = #tpu.pipeline_mode<synchronous>, transform_indices = @transform_3, window_bounds = array<i64: 512, 1>}, {transform_indices = @transform_4, window_bounds = array<i64: 1>}, {transform_indices = @transform_5, window_bounds = array<i64: 2, 1>}]} {
    %c0 = arith.constant 0 : index
    %c0_0 = arith.constant 0 : index
    %c0_1 = arith.constant 0 : index
    %0 = vector.load %arg1[%c0, %c0_0, %c0_1] : memref<2x512x128xf32, #tpu.memory_space<vmem>>, vector<2x512x128xf32>
    %1 = vector.shape_cast %0 : vector<2x512x128xf32> to vector<1024x128xf32>
    %c0_2 = arith.constant 0 : index
    %c0_3 = arith.constant 0 : index
    %2 = vector.load %arg2[%c0_2, %c0_3] : memref<128x1xf32, #tpu.memory_space<vmem>>, vector<128x1xf32>
    %cst = arith.constant dense<0.000000e+00> : vector<1024x1xf32>
    %3 = tpu.matmul %1, %2, %cst {dimension_numbers = #tpu.dot_dimension_numbers<[1], [0], [0], [1], [0, 0, 1, 1], [], []>} : vector<1024x128xf32>, vector<128x1xf32>, vector<1024x1xf32> -> vector<1024x1xf32>
    %c0_4 = arith.constant 0 : index
    %4 = memref.load %arg3[%c0_4] : memref<1xf32, #tpu.memory_space<smem>>
    %5 = vector.broadcast %4 : f32 to vector<1024x1xf32>
    %6 = arith.addf %3, %5 : vector<1024x1xf32>
    %7 = math.tanh %6 : vector<1024x1xf32>
    %8 = vector.shape_cast %7 : vector<1024x1xf32> to vector<2x512x1xf32>
    %c0_5 = arith.constant 0 : index
    %c0_6 = arith.constant 0 : index
    %9 = vector.load %arg4[%c0_5, %c0_6] : memref<512x1xf32, #tpu.memory_space<vmem>>, vector<512x1xf32>
    %10 = vector.shape_cast %9 : vector<512x1xf32> to vector<1x512x1xf32>
    %11 = vector.broadcast %10 : vector<1x512x1xf32> to vector<2x512x1xf32>
    %12 = arith.mulf %8, %11 : vector<2x512x1xf32>
    %cst_7 = arith.constant dense<0.000000e+00> : vector<2x1xf32>
    %13 = vector.multi_reduction <add>, %12, %cst_7 [1] : vector<2x512x1xf32> to vector<2x1xf32>
    %c0_8 = arith.constant 0 : index
    %14 = memref.load %arg5[%c0_8] : memref<1xf32, #tpu.memory_space<smem>>
    %15 = vector.broadcast %14 : f32 to vector<2x1xf32>
    %16 = arith.addf %13, %15 : vector<2x1xf32>
    %c0_9 = arith.constant 0 : index
    %c0_10 = arith.constant 0 : index
    %17 = vector.load %arg6[%c0_9, %c0_10] : memref<2x1xf32, #tpu.memory_space<vmem>>, vector<2x1xf32>
    tpu.vector_store %arg6[%c0_9, %c0_10], %16 {strides = array<i32>} : memref<2x1xf32, #tpu.memory_space<vmem>>, vector<2x1xf32>,
    return
  }
  func.func @transform_0(%arg0: i32) -> (i32, i32, i32) {
    %c0_i32 = arith.constant 0 : i32
    %c0_i32_0 = arith.constant 0 : i32
    %c0_i32_1 = arith.constant 0 : i32
    return %arg0, %c0_i32, %c0_i32_0 : i32, i32, i32
  }
  func.func @transform_1(%arg0: i32) -> (i32, i32) {
    %c0_i32 = arith.constant 0 : i32
    %c0_i32_0 = arith.constant 0 : i32
    %c0_i32_1 = arith.constant 0 : i32
    return %c0_i32, %c0_i32_0 : i32, i32
  }
  func.func @transform_2(%arg0: i32) -> i32 {
    %c0_i32 = arith.constant 0 : i32
    %c0_i32_0 = arith.constant 0 : i32
    return %c0_i32 : i32
  }
  func.func @transform_3(%arg0: i32) -> (i32, i32) {
    %c0_i32 = arith.constant 0 : i32
    %c0_i32_0 = arith.constant 0 : i32
    %c0_i32_1 = arith.constant 0 : i32
    return %c0_i32, %c0_i32_0 : i32, i32
  }
  func.func @transform_4(%arg0: i32) -> i32 {
    %c0_i32 = arith.constant 0 : i32
    %c0_i32_0 = arith.constant 0 : i32
    return %c0_i32 : i32
  }
  func.func @transform_5(%arg0: i32) -> (i32, i32) {
    %c0_i32 = arith.constant 0 : i32
    %c0_i32_0 = arith.constant 0 : i32
    return %arg0, %c0_i32 : i32, i32
  }
}

</mosaic_0001>

<bundles_post_ra>
// kernel: tpu_custom_call.1
= control target key start
LH: loop header
LB: loop body
LE: loop exit
PB: predicated region body
PF: predicated region fallthrough
CT: control target
= control target key end

     0   :  { %12 = vsyncpa [#allocation5], 0  ;;  %s1521_s21 = smov [#allocation4]   ;;  %s1522_s23 = smov 128   ;;  %s2425_s0 = inlined_call_operand.hbm [shape: f32[2,512,128], index: 0, kind: input, shape index: {}]   ;;  %s2426_s1 = inlined_call_operand.vmem [shape: f32[128,1], index: 1, kind: input, shape index: {}]   ;;  %s2427_s2 = inlined_call_operand.<no memory space> [shape: f32[1], index: 2, kind: input, shape index: {}]   ;;  %s2428_s3 = inlined_call_operand.vmem [shape: f32[512,1], index: 3, kind: input, shape index: {}]   ;;  %s2429_s4 = inlined_call_operand.<no memory space> [shape: f32[1], index: 4, kind: input, shape index: {}]   ;;  %s2430_s5 = inlined_call_operand.vmem [shape: f32[2,1], index: 5, kind: output, shape index: {}]  }
   0x1   :  { %s17_s20 = sshll.u32 %s2425_s0, 4  ;;  %s19_s22 = sshll.u32 %s1521_s21, 4  ;;  %s18_s20 = int_to_ptr.hbm [resolvable:$true] %s17_s20  ;;  %s20_s22 = int_to_ptr.vmem [resolvable:$true] %s19_s22 }
   0x2   :  { %s1523_s24 = smov 8  }
   0x3   :  { %25 = dma.hbm_to_vmem [thread:$0]  %s18_s20, 16384, %s20_s22, [#allocation5], %s1522_s23, %s1522_s23, %s1523_s24  }
   0x4   :  { %1519 = dma.done.wait [#allocation5], 16384  }
   0x5   :  { %1520 = vsyncadd [#allocation5], 4294950912  ;;  %v181_v0 = vld [vmem:[%s2426_s1 + $0x78] sm:$0xff]  ;;  %v180_v1 = vld [vmem:[%s2426_s1 + $0x70] sm:$0xff]  ;;  %vm905_vm0 = vcmask 7168   ;;  %vm1178_vm1 = vcmask 1041409  }
   0x6   :  { %184 = vmatpush.msra.mxu0 %v181_v0  ;;  %1189 = vmatpush.msra.mxu2 %v181_v0  ;;  %v179_v2 = vld [vmem:[%s2426_s1 + $0x68] sm:$0xff]  ;;  %v178_v3 = vld [vmem:[%s2426_s1 + $0x60] sm:$0xff]  ;;  %v177_v4 = vld [vmem:[%s2426_s1 + $0x58] sm:$0xff]  ;;  %vm1181_vm2 = vcmask 1024  }
   0x7   :  { %1188 = vmatpush.msra.mxu1 %v181_v0  ;;  %1190 = vmatpush.msra.mxu3 %v181_v0  ;;  %v176_v5 = vld [vmem:[%s2426_s1 + $0x50] sm:$0xff]  ;;  %v175_v6 = vld [vmem:[%s2426_s1 + $0x48] sm:$0xff]  ;;  %v174_v7 = vld [vmem:[%s2426_s1 + $0x40] sm:$0xff] }
   0x8   :  { %185 = vmatpush.msra.mxu0 %v180_v1  ;;  %1192 = vmatpush.msra.mxu2 %v180_v1  ;;  %v173_v8 = vld [vmem:[%s2426_s1 + $0x38] sm:$0xff]  ;;  %v172_v9 = vld [vmem:[%s2426_s1 + $0x30] sm:$0xff]  ;;  %v171_v10 = vld [vmem:[%s2426_s1 + $0x28] sm:$0xff] }
   0x9   :  { %1191 = vmatpush.msra.mxu1 %v180_v1  ;;  %1193 = vmatpush.msra.mxu3 %v180_v1  ;;  %v170_v11 = vld [vmem:[%s2426_s1 + $0x20] sm:$0xff]  ;;  %v169_v12 = vld [vmem:[%s2426_s1 + $0x18] sm:$0xff]  ;;  %v168_v13 = vld [vmem:[%s2426_s1 + $0x10] sm:$0xff] }
   0xa   :  { %186 = vmatpush.msra.mxu0 %v179_v2  ;;  %1195 = vmatpush.msra.mxu2 %v179_v2  ;;  %v167_v14 = vld [vmem:[%s2426_s1 + $0x8] sm:$0xff]  ;;  %v166_v15 = vld [vmem:[%s2426_s1] sm:$0xff]  ;;  %v40_v20 = vld [vmem:[#allocation4 + $0x10] sm:$0xff] }
   0xb   :  { %1194 = vmatpush.msra.mxu1 %v179_v2  ;;  %1196 = vmatpush.msra.mxu3 %v179_v2  ;;  %v38_v16 = vld [vmem:[#allocation4] sm:$0xff]  ;;  %v39_v18 = vld [vmem:[#allocation4 + $0x8] sm:$0xff]  ;;  %v104_v21 = vld [vmem:[#allocation4 + $0x210] sm:$0xff] }
   0xc   :  { %187 = vmatpush.msra.mxu0 %v178_v3  ;;  %1198 = vmatpush.msra.mxu2 %v178_v3  ;;  %v102_v17 = vld [vmem:[#allocation4 + $0x200] sm:$0xff]  ;;  %v103_v19 = vld [vmem:[#allocation4 + $0x208] sm:$0xff]  ;;  %v41_v22 = vld [vmem:[#allocation4 + $0x18] sm:$0xff] }
   0xd   :  { %1197 = vmatpush.msra.mxu1 %v178_v3  ;;  %1199 = vmatpush.msra.mxu3 %v178_v3  ;;  %v105_v23 = vld [vmem:[#allocation4 + $0x218] sm:$0xff]  ;;  %v42_v24 = vld [vmem:[#allocation4 + $0x20] sm:$0xff]  ;;  %v43_v28 = vld [vmem:[#allocation4 + $0x28] sm:$0xff] }
   0xe   :  { %188 = vmatpush.msra.mxu0 %v177_v4  ;;  %1201 = vmatpush.msra.mxu2 %v177_v4  ;;  %v106_v25 = vld [vmem:[#allocation4 + $0x220] sm:$0xff]  ;;  %v107_v29 = vld [vmem:[#allocation4 + $0x228] sm:$0xff]  ;;  %v44_v32 = vld [vmem:[#allocation4 + $0x30] sm:$0xff] }
   0xf   :  { %1200 = vmatpush.msra.mxu1 %v177_v4  ;;  %1202 = vmatpush.msra.mxu3 %v177_v4  ;;  %v70_v26 = vld [vmem:[#allocation4 + $0x100] sm:$0xff]  ;;  %v71_v30 = vld [vmem:[#allocation4 + $0x108] sm:$0xff]  ;;  %v108_v33 = vld [vmem:[#allocation4 + $0x230] sm:$0xff] }
  0x10   :  { %189 = vmatpush.msra.mxu0 %v176_v5  ;;  %1204 = vmatpush.msra.mxu2 %v176_v5  ;;  %v134_v27 = vld [vmem:[#allocation4 + $0x300] sm:$0xff]  ;;  %v135_v31 = vld [vmem:[#allocation4 + $0x308] sm:$0xff]  ;;  %v72_v34 = vld [vmem:[#allocation4 + $0x110] sm:$0xff] }
  0x11   :  { %1203 = vmatpush.msra.mxu1 %v176_v5  ;;  %1205 = vmatpush.msra.mxu3 %v176_v5  ;;  %v136_v35 = vld [vmem:[#allocation4 + $0x310] sm:$0xff]  ;;  %v45_v36 = vld [vmem:[#allocation4 + $0x38] sm:$0xff]  ;;  %v46_v40 = vld [vmem:[#allocation4 + $0x40] sm:$0xff] }
  0x12   :  { %190 = vmatpush.msra.mxu0 %v175_v6  ;;  %1207 = vmatpush.msra.mxu2 %v175_v6  ;;  %v109_v37 = vld [vmem:[#allocation4 + $0x238] sm:$0xff]  ;;  %v110_v41 = vld [vmem:[#allocation4 + $0x240] sm:$0xff]  ;;  %v47_v44 = vld [vmem:[#allocation4 + $0x48] sm:$0xff] }
  0x13   :  { %1206 = vmatpush.msra.mxu1 %v175_v6  ;;  %1208 = vmatpush.msra.mxu3 %v175_v6  ;;  %v73_v38 = vld [vmem:[#allocation4 + $0x118] sm:$0xff]  ;;  %v74_v42 = vld [vmem:[#allocation4 + $0x120] sm:$0xff]  ;;  %v111_v45 = vld [vmem:[#allocation4 + $0x248] sm:$0xff] }
  0x14   :  { %191 = vmatpush.msra.mxu0 %v174_v7  ;;  %1210 = vmatpush.msra.mxu2 %v174_v7  ;;  %v137_v39 = vld [vmem:[#allocation4 + $0x318] sm:$0xff]  ;;  %v138_v43 = vld [vmem:[#allocation4 + $0x320] sm:$0xff]  ;;  %v75_v46 = vld [vmem:[#allocation4 + $0x128] sm:$0xff] }
  0x15   :  { %1209 = vmatpush.msra.mxu1 %v174_v7  ;;  %1211 = vmatpush.msra.mxu3 %v174_v7  ;;  %v139_v47 = vld [vmem:[#allocation4 + $0x328] sm:$0xff]  ;;  %v48_v48 = vld [vmem:[#allocation4 + $0x50] sm:$0xff]  ;;  %v49_v52 = vld [vmem:[#allocation4 + $0x58] sm:$0xff] }
  0x16   :  { %192 = vmatpush.msra.mxu0 %v173_v8  ;;  %1213 = vmatpush.msra.mxu2 %v173_v8  ;;  %v112_v49 = vld [vmem:[#allocation4 + $0x250] sm:$0xff]  ;;  %v113_v53 = vld [vmem:[#allocation4 + $0x258] sm:$0xff]  ;;  %v50_v56 = vld [vmem:[#allocation4 + $0x60] sm:$0xff] }
  0x17   :  { %1212 = vmatpush.msra.mxu1 %v173_v8  ;;  %1214 = vmatpush.msra.mxu3 %v173_v8  ;;  %v76_v50 = vld [vmem:[#allocation4 + $0x130] sm:$0xff]  ;;  %v77_v54 = vld [vmem:[#allocation4 + $0x138] sm:$0xff]  ;;  %v114_v57 = vld [vmem:[#allocation4 + $0x260] sm:$0xff] }
  0x18   :  { %193 = vmatpush.msra.mxu0 %v172_v9  ;;  %1216 = vmatpush.msra.mxu2 %v172_v9  ;;  %v140_v51 = vld [vmem:[#allocation4 + $0x330] sm:$0xff]  ;;  %v141_v55 = vld [vmem:[#allocation4 + $0x338] sm:$0xff]  ;;  %v78_v58 = vld [vmem:[#allocation4 + $0x140] sm:$0xff] }
  0x19   :  { %1215 = vmatpush.msra.mxu1 %v172_v9  ;;  %1217 = vmatpush.msra.mxu3 %v172_v9  ;;  %v142_v59 = vld [vmem:[#allocation4 + $0x340] sm:$0xff]  ;;  %v51_v60 = vld [vmem:[#allocation4 + $0x68] sm:$0xff]  ;;  %v52_v0 = vld [vmem:[#allocation4 + $0x70] sm:$0xff] }
  0x1a   :  { %194 = vmatpush.msra.mxu0 %v171_v10  ;;  %1219 = vmatpush.msra.mxu2 %v171_v10  ;;  %v115_v61 = vld [vmem:[#allocation4 + $0x268] sm:$0xff]  ;;  %v116_v1 = vld [vmem:[#allocation4 + $0x270] sm:$0xff]  ;;  %v53_v4 = vld [vmem:[#allocation4 + $0x78] sm:$0xff] }
  0x1b   :  { %1218 = vmatpush.msra.mxu1 %v171_v10  ;;  %1220 = vmatpush.msra.mxu3 %v171_v10  ;;  %v79_v62 = vld [vmem:[#allocation4 + $0x148] sm:$0xff]  ;;  %v80_v2 = vld [vmem:[#allocation4 + $0x150] sm:$0xff]  ;;  %v117_v5 = vld [vmem:[#allocation4 + $0x278] sm:$0xff] }
  0x1c   :  { %195 = vmatpush.msra.mxu0 %v170_v11  ;;  %1222 = vmatpush.msra.mxu2 %v170_v11  ;;  %v143_v63 = vld [vmem:[#allocation4 + $0x348] sm:$0xff]  ;;  %v144_v3 = vld [vmem:[#allocation4 + $0x350] sm:$0xff]  ;;  %v81_v6 = vld [vmem:[#allocation4 + $0x158] sm:$0xff] }
  0x1d   :  { %1221 = vmatpush.msra.mxu1 %v170_v11  ;;  %1223 = vmatpush.msra.mxu3 %v170_v11  ;;  %v145_v7 = vld [vmem:[#allocation4 + $0x358] sm:$0xff]  ;;  %v54_v9 = vld [vmem:[#allocation4 + $0x80] sm:$0xff] }
  0x1e   :  { %196 = vmatpush.msra.mxu0 %v169_v12  ;;  %1225 = vmatpush.msra.mxu2 %v169_v12  ;;  %v118_v10 = vld [vmem:[#allocation4 + $0x280] sm:$0xff] }
  0x1f   :  { %1224 = vmatpush.msra.mxu1 %v169_v12  ;;  %1226 = vmatpush.msra.mxu3 %v169_v12  ;;  %v82_v11 = vld [vmem:[#allocation4 + $0x160] sm:$0xff] }
  0x20   :  { %197 = vmatpush.msra.mxu0 %v168_v13  ;;  %1228 = vmatpush.msra.mxu2 %v168_v13  ;;  %v146_v12 = vld [vmem:[#allocation4 + $0x360] sm:$0xff] }
  0x21   :  { %1227 = vmatpush.msra.mxu1 %v168_v13  ;;  %1229 = vmatpush.msra.mxu3 %v168_v13  ;;  %v1610_v13 = vstv %s2427_s2 }
  0x22   :  { %198 = vmatpush.msra.mxu0 %v167_v14  ;;  %1231 = vmatpush.msra.mxu2 %v167_v14 }
  0x23   :  { %1230 = vmatpush.msra.mxu1 %v167_v14  ;;  %1232 = vmatpush.msra.mxu3 %v167_v14 }
  0x24   :  { %199 = vmatpush.msra.mxu0 %v166_v15  ;;  %1234 = vmatpush.msra.mxu2 %v166_v15 }
  0x25   :  { %200 = vmatmul.f32.vlgmr.msra.gmra.mxu0 %v38_v16  ;;  %392 = vmatmul.f32.vlgmr.msra.gmra.mxu2 %v102_v17  ;;  %v55_v16 = vld [vmem:[#allocation4 + $0x88] sm:$0xff] }
  0x26   :  { %1233 = vmatpush.msra.mxu1 %v166_v15  ;;  %1235 = vmatpush.msra.mxu3 %v166_v15  ;;  %v119_v17 = vld [vmem:[#allocation4 + $0x288] sm:$0xff] }
  0x27   :  { %296 = vmatmul.f32.vlgmr.msra.gmra.mxu1 %v70_v26  ;;  %488 = vmatmul.f32.vlgmr.msra.gmra.mxu3 %v134_v27  ;;  %v84_v26 = vld [vmem:[#allocation4 + $0x170] sm:$0xff] }
  0x2d   :  { %203 = vmatmul.f32.gmra.mxu0 %v39_v18  ;;  %395 = vmatmul.f32.gmra.mxu2 %v103_v19  ;;  %v83_v19 = vld [vmem:[#allocation4 + $0x168] sm:$0xff] }
  0x2f   :  { %299 = vmatmul.f32.gmra.mxu1 %v71_v30  ;;  %491 = vmatmul.f32.gmra.mxu3 %v135_v31 }
  0x35   :  { %206 = vmatmul.f32.gmra.mxu0 %v40_v20  ;;  %398 = vmatmul.f32.gmra.mxu2 %v104_v21  ;;  %v147_v20 = vld [vmem:[#allocation4 + $0x368] sm:$0xff] }
  0x37   :  { %302 = vmatmul.f32.gmra.mxu1 %v72_v34  ;;  %494 = vmatmul.f32.gmra.mxu3 %v136_v35 }
  0x3d   :  { %209 = vmatmul.f32.gmra.mxu0 %v41_v22  ;;  %401 = vmatmul.f32.gmra.mxu2 %v105_v23 }
  0x3f   :  { %305 = vmatmul.f32.gmra.mxu1 %v73_v38  ;;  %497 = vmatmul.f32.gmra.mxu3 %v137_v39  ;;  %v121_v38 = vld [vmem:[#allocation4 + $0x298] sm:$0xff] }
  0x45   :  { %212 = vmatmul.f32.gmra.mxu0 %v42_v24  ;;  %404 = vmatmul.f32.gmra.mxu2 %v106_v25  ;;  %v56_v24 = vld [vmem:[#allocation4 + $0x90] sm:$0xff] }
  0x46   :  { %v120_v25 = vld [vmem:[#allocation4 + $0x290] sm:$0xff] }
  0x47   :  { %308 = vmatmul.f32.gmra.mxu1 %v74_v42  ;;  %500 = vmatmul.f32.gmra.mxu3 %v138_v43  ;;  %v149_v43 = vld [vmem:[#allocation4 + $0x378] sm:$0xff] }
  0x4d   :  { %215 = vmatmul.f32.gmra.mxu0 %v43_v28  ;;  %407 = vmatmul.f32.gmra.mxu2 %v107_v29  ;;  %v1621_v28 = vld [vmem:[%s2428_s3] sm:$0xff]  ;;  %v148_v29 = vld [vmem:[#allocation4 + $0x370] sm:$0xff] }
  0x4f   :  { %311 = vmatmul.f32.gmra.mxu1 %v75_v46  ;;  %503 = vmatmul.f32.gmra.mxu3 %v139_v47  ;;  %v1638_v46 = vld [vmem:[%s2428_s3 + $0x10] sm:$0xff] }
  0x55   :  { %218 = vmatmul.f32.gmra.mxu0 %v44_v32  ;;  %410 = vmatmul.f32.gmra.mxu2 %v108_v33  ;;  %v1627_v33 = vld [vmem:[%s2428_s3 + $0x8] sm:$0xff] }
  0x57   :  { %314 = vmatmul.f32.gmra.mxu1 %v76_v50  ;;  %506 = vmatmul.f32.gmra.mxu3 %v140_v51  ;;  %v58_v50 = vld [vmem:[#allocation4 + $0xa0] sm:$0xff] }
  0x58   :  { %v122_v51 = vld [vmem:[#allocation4 + $0x2a0] sm:$0xff] }
  0x5d   :  { %221 = vmatmul.f32.gmra.mxu0 %v45_v36  ;;  %413 = vmatmul.f32.gmra.mxu2 %v109_v37  ;;  %v57_v37 = vld [vmem:[#allocation4 + $0x98] sm:$0xff] }
  0x5f   :  { %317 = vmatmul.f32.gmra.mxu1 %v77_v54  ;;  %509 = vmatmul.f32.gmra.mxu3 %v141_v55  ;;  %v86_v54 = vld [vmem:[#allocation4 + $0x180] sm:$0xff] }
  0x65   :  { %224 = vmatmul.f32.gmra.mxu0 %v46_v40  ;;  %416 = vmatmul.f32.gmra.mxu2 %v110_v41  ;;  %v85_v41 = vld [vmem:[#allocation4 + $0x178] sm:$0xff] }
  0x67   :  { %320 = vmatmul.f32.gmra.mxu1 %v78_v58  ;;  %512 = vmatmul.f32.gmra.mxu3 %v142_v59  ;;  %v1648_v59 = vld [vmem:[%s2428_s3 + $0x18] sm:$0xff] }
  0x6d   :  { %227 = vmatmul.f32.gmra.mxu0 %v47_v44  ;;  %419 = vmatmul.f32.gmra.mxu2 %v111_v45 }
  0x6f   :  { %323 = vmatmul.f32.gmra.mxu1 %v79_v62  ;;  %515 = vmatmul.f32.gmra.mxu3 %v143_v63 }
  0x75   :  { %230 = vmatmul.f32.gmra.mxu0 %v48_v48  ;;  %422 = vmatmul.f32.gmra.mxu2 %v112_v49 }
  0x77   :  { %326 = vmatmul.f32.gmra.mxu1 %v80_v2  ;;  %518 = vmatmul.f32.gmra.mxu3 %v144_v3 }
  0x7d   :  { %233 = vmatmul.f32.gmra.mxu0 %v49_v52  ;;  %425 = vmatmul.f32.gmra.mxu2 %v113_v53 }
  0x7f   :  { %329 = vmatmul.f32.gmra.mxu1 %v81_v6  ;;  %521 = vmatmul.f32.gmra.mxu3 %v145_v7  ;;  %v151_v6 = vld [vmem:[#allocation4 + $0x388] sm:$0xff] }
  0x85   :  { %236 = vmatmul.f32.gmra.mxu0 %v50_v56  ;;  %428 = vmatmul.f32.gmra.mxu2 %v114_v57  ;;  %v150_v56 = vld [vmem:[#allocation4 + $0x380] sm:$0xff] }
  0x87   :  { %332 = vmatmul.f32.gmra.mxu1 %v82_v11  ;;  %524 = vmatmul.f32.gmra.mxu3 %v146_v12 }
  0x8d   :  { %239 = vmatmul.f32.gmra.mxu0 %v51_v60  ;;  %431 = vmatmul.f32.gmra.mxu2 %v115_v61 }
  0x8f   :  { %335 = vmatmul.f32.gmra.mxu1 %v83_v19  ;;  %527 = vmatmul.f32.gmra.mxu3 %v147_v20 }
  0x95   :  { %242 = vmatmul.f32.gmra.mxu0 %v52_v0  ;;  %434 = vmatmul.f32.gmra.mxu2 %v116_v1  ;;  %v59_v0 = vld [vmem:[#allocation4 + $0xa8] sm:$0xff] }
  0x96   :  { %v123_v1 = vld [vmem:[#allocation4 + $0x2a8] sm:$0xff] }
  0x97   :  { %338 = vmatmul.f32.gmra.mxu1 %v84_v26  ;;  %530 = vmatmul.f32.gmra.mxu3 %v148_v29 }
  0x9d   :  { %245 = vmatmul.f32.gmra.mxu0 %v53_v4  ;;  %437 = vmatmul.f32.gmra.mxu2 %v117_v5  ;;  %v87_v4 = vld [vmem:[#allocation4 + $0x188] sm:$0xff] }
  0x9f   :  { %341 = vmatmul.f32.gmra.mxu1 %v85_v41  ;;  %533 = vmatmul.f32.gmra.mxu3 %v149_v43  ;;  %v89_v41 = vld [vmem:[#allocation4 + $0x198] sm:$0xff] }
  0xa2   :  { %v1605_v8 = vpop.f32.mrf.mxu0 }
  0xa4   :  { %v1642_v52 = vpop.f32.mrf.mxu1 }
  0xa5   :  { %248 = vmatmul.f32.gmra.mxu0 %v54_v9  ;;  %440 = vmatmul.f32.gmra.mxu2 %v118_v10  ;;  %v1660_v10 = vld [vmem:[%s2428_s3 + $0x20] sm:$0xff] }
  0xa7   :  { %344 = vmatmul.f32.gmra.mxu1 %v86_v54  ;;  %536 = vmatmul.f32.gmra.mxu3 %v150_v56 }
  0xa8   :  { %v393_v14 = vpop.f32.mrf.mxu2 }
  0xa9   :  { %v394_v18 = vadd.f32 %v393_v14, %v1610_v13 }
  0xaa   :  { %v1612_v15 = vpop.f32.mrf.mxu0  ;;  %v1651_v61 = vpop.f32.mrf.mxu3 }
  0xab   :  { %1239 = vtanh.f32 %v394_v18  ;;  %v124_v18 = vld [vmem:[#allocation4 + $0x2b0] sm:$0xff]  ;;  %v205_v19 = vadd.f32 %v1612_v15, %v1610_v13 }
  0xac   :  { %v1654_v2 = vpop.f32.mrf.mxu1 }
  0xad   :  { %251 = vmatmul.f32.gmra.mxu0 %v55_v16  ;;  %443 = vmatmul.f32.gmra.mxu2 %v119_v17  ;;  %v60_v17 = vld [vmem:[#allocation4 + $0xb0] sm:$0xff] }
  0xaf   :  { %347 = vmatmul.f32.gmra.mxu1 %v87_v4  ;;  %539 = vmatmul.f32.gmra.mxu3 %v151_v6 }
  0xb0   :  { %v396_v21 = vpop.f32.mrf.mxu2 }
  0xb1   :  { %v397_v22 = vadd.f32 %v396_v21, %v1610_v13  ;;  %v1240_v27 = vpop.eup %1239  ;;  %v202_v21 = vadd.f32 %v1605_v8, %v1610_v13 }
  0xb2   :  { %v1616_v23 = vpop.f32.mrf.mxu0  ;;  %v841_v30 = vmul.f32 %v1240_v27, %v1621_v28  ;;  %v1663_v12 = vpop.f32.mrf.mxu3  ;;  %v152_v27 = vld [vmem:[#allocation4 + $0x390] sm:$0xff] }
  0xb3   :  { %1241 = vtanh.f32 %v397_v22 }
  0xb4   :  { %v1039_v39 = vsel %vm905_vm0, %v841_v30, 0.0  ;;  %v1668_v20 = vpop.f32.mrf.mxu1 }
  0xb5   :  { %254 = vmatmul.f32.gmra.mxu0 %v56_v24  ;;  %446 = vmatmul.f32.gmra.mxu2 %v120_v25  ;;  %v88_v24 = vld [vmem:[#allocation4 + $0x190] sm:$0xff]  ;;  %v208_v25 = vadd.f32 %v1616_v23, %v1610_v13  ;;  %v1681_v23 = vld [vmem:[%s2428_s3 + $0x28] sm:$0xff] }
  0xb7   :  { %350 = vmatmul.f32.gmra.mxu1 %v88_v24  ;;  %542 = vmatmul.f32.gmra.mxu3 %v152_v27  ;;  %v720_v27 = vld [vmem:[%s2428_s3 + $0x38] sm:$0xff] }
  0xb8   :  { %v399_v31 = vpop.f32.mrf.mxu2 }
  0xb9   :  { %v1242_v32 = vpop.eup %1241  ;;  %v400_v34 = vadd.f32 %v399_v31, %v1610_v13 }
  0xba   :  { %v842_v35 = vmul.f32 %v1242_v32, %v1627_v33  ;;  %v1631_v36 = vpop.f32.mrf.mxu0  ;;  %v1684_v32 = vpop.f32.mrf.mxu3 }
  0xbb   :  { %1243 = vtanh.f32 %v400_v34  ;;  %v211_v29 = vadd.f32 %v1631_v36, %v1610_v13  ;;  %v61_v36 = vld [vmem:[#allocation4 + $0xb8] sm:$0xff] }
  0xbc   :  { %v1040_v40 = vsel %vm905_vm0, %v842_v35, 0.0 }
  0xbd   :  { %v1041_v42 = vadd.f32 %v1040_v40, %v1039_v39  ;;  %257 = vmatmul.f32.gmra.mxu0 %v57_v37  ;;  %449 = vmatmul.f32.gmra.mxu2 %v121_v38  ;;  %v125_v37 = vld [vmem:[#allocation4 + $0x2b8] sm:$0xff]  ;;  %v1688_v39 = vpop.f32.mrf.mxu1 }
  0xbf   :  { %353 = vmatmul.f32.gmra.mxu1 %v89_v41 }
  0xc0   :  { %v402_v44 = vpop.f32.mrf.mxu2 }
  0xc1   :  { %v1244_v45 = vpop.eup %1243  ;;  %v403_v47 = vadd.f32 %v402_v44, %v1610_v13 }
  0xc2   :  { %v843_v48 = vmul.f32 %v1244_v45, %v1638_v46  ;;  %v213_v49 = vpop.f32.mrf.mxu0  ;;  %v153_v45 = vld [vmem:[#allocation4 + $0x398] sm:$0xff] }
  0xc3   :  { %1245 = vtanh.f32 %v403_v47  ;;  %v214_v8 = vadd.f32 %v213_v49, %v1610_v13  ;;  %545 = vmatmul.f32.gmra.mxu3 %v153_v45 }
  0xc4   :  { %v1042_v53 = vsel %vm905_vm0, %v843_v48, 0.0 }
  0xc5   :  { %v1043_v55 = vadd.f32 %v1042_v53, %v1041_v42  ;;  %260 = vmatmul.f32.gmra.mxu0 %v58_v50  ;;  %452 = vmatmul.f32.gmra.mxu2 %v122_v51  ;;  %v1703_v4 = vpop.f32.mrf.mxu1 }
  0xc8   :  { %v405_v57 = vpop.f32.mrf.mxu2 }
  0xc9   :  { %v1246_v58 = vpop.eup %1245  ;;  %v406_v60 = vadd.f32 %v405_v57, %v1610_v13  ;;  %v1698_v57 = vpop.f32.mrf.mxu3 }
  0xca   :  { %v844_v62 = vmul.f32 %v1246_v58, %v1648_v59  ;;  %v216_v63 = vpop.f32.mrf.mxu0 }
  0xcb   :  { %1247 = vtanh.f32 %v406_v60  ;;  %v217_v38 = vadd.f32 %v216_v63, %v1610_v13 }
  0xcc   :  { %v1044_v3 = vsel %vm905_vm0, %v844_v62, 0.0 }
  0xcd   :  { %v1045_v5 = vadd.f32 %v1044_v3, %v1043_v55  ;;  %263 = vmatmul.f32.gmra.mxu0 %v59_v0  ;;  %455 = vmatmul.f32.gmra.mxu2 %v123_v1  ;;  %v719_v55 = vld [vmem:[%s2428_s3 + $0x30] sm:$0xff]  ;;  %v62_v0 = vld [vmem:[#allocation4 + $0xc0] sm:$0xff] }
  0xd0   :  { %v408_v7 = vpop.f32.mrf.mxu2 }
  0xd1   :  { %v1248_v9 = vpop.eup %1247  ;;  %v409_v11 = vadd.f32 %v408_v7, %v1610_v13 }
  0xd2   :  { %v845_v14 = vmul.f32 %v1248_v9, %v1660_v10  ;;  %v219_v16 = vpop.f32.mrf.mxu0 }
  0xd3   :  { %1249 = vtanh.f32 %v409_v11  ;;  %v220_v44 = vadd.f32 %v219_v16, %v1610_v13  ;;  %v154_v11 = vld [vmem:[#allocation4 + $0x3a0] sm:$0xff] }
  0xd4   :  { %v1046_v22 = vsel %vm905_vm0, %v845_v14, 0.0  ;;  %1251 = vtanh.f32 %v205_v19  ;;  %548 = vmatmul.f32.gmra.mxu3 %v154_v11  ;;  %v92_v11 = vld [vmem:[#allocation4 + $0x1b0] sm:$0xff] }
  0xd5   :  { %v1047_v26 = vadd.f32 %v1046_v22, %v1045_v5  ;;  %266 = vmatmul.f32.gmra.mxu0 %v60_v17  ;;  %458 = vmatmul.f32.gmra.mxu2 %v124_v18  ;;  %1253 = vtanh.f32 %v202_v21 }
  0xd6   :  { %1255 = vtanh.f32 %v208_v25 }
  0xd7   :  { %1257 = vtanh.f32 %v211_v29 }
  0xd8   :  { %v411_v15 = vpop.f32.mrf.mxu2 }
  0xd9   :  { %v1250_v30 = vpop.eup %1249  ;;  %v412_v31 = vadd.f32 %v411_v15, %v1610_v13  ;;  %v1717_v15 = vpop.f32.mrf.mxu3 }
  0xda   :  { %v846_v34 = vmul.f32 %v1250_v30, %v1681_v23  ;;  %v222_v35 = vpop.f32.mrf.mxu0  ;;  %v1252_v42 = vpop.eup %1251 }
  0xdb   :  { %1259 = vtanh.f32 %v412_v31  ;;  %v1254_v47 = vpop.eup %1253  ;;  %v223_v48 = vadd.f32 %v222_v35, %v1610_v13  ;;  %v778_v51 = vmul.f32 %v1252_v42, %v1627_v33  ;;  %v126_v33 = vld [vmem:[#allocation4 + $0x2c0] sm:$0xff]  ;;  %v127_v35 = vld [vmem:[#allocation4 + $0x2c8] sm:$0xff] }
  0xdc   :  { %v1048_v40 = vsel %vm905_vm0, %v846_v34, 0.0  ;;  %1261 = vtanh.f32 %v214_v8  ;;  %v1256_v49 = vpop.eup %1255  ;;  %v777_v58 = vmul.f32 %v1254_v47, %v1621_v28  ;;  %v90_v28 = vld [vmem:[#allocation4 + $0x1a0] sm:$0xff]  ;;  %v63_v34 = vld [vmem:[#allocation4 + $0xc8] sm:$0xff] }
  0xdd   :  { %v1049_v43 = vadd.f32 %v1048_v40, %v1047_v26  ;;  %269 = vmatmul.f32.gmra.mxu0 %v61_v36  ;;  %461 = vmatmul.f32.gmra.mxu2 %v125_v37  ;;  %1263 = vtanh.f32 %v217_v38  ;;  %v1258_v50 = vpop.eup %1257  ;;  %v779_v60 = vmul.f32 %v1256_v49, %v1638_v46  ;;  %v907_v5 = vsel %vm905_vm0, %v778_v51, 0.0  ;;  %v721_v37 = vld [vmem:[%s2428_s3 + $0x40] sm:$0xff]  ;;  %v1724_v40 = vpop.f32.mrf.mxu1 }
  0xde   :  { %1265 = vtanh.f32 %v220_v44  ;;  %v780_v6 = vmul.f32 %v1258_v50, %v1648_v59  ;;  %v906_v14 = vsel %vm905_vm0, %v777_v58, 0.0  ;;  %356 = vmatmul.f32.gmra.mxu1 %v90_v28  ;;  %v91_v44 = vld [vmem:[#allocation4 + $0x1a8] sm:$0xff] }
  0xdf   :  { %1267 = vtanh.f32 %v223_v48  ;;  %v909_v16 = vsel %vm905_vm0, %v779_v60, 0.0  ;;  %v908_v19 = vadd.f32 %v907_v5, %v906_v14  ;;  %v155_v48 = vld [vmem:[#allocation4 + $0x3a8] sm:$0xff] }
  0xe0   :  { %v414_v53 = vpop.f32.mrf.mxu2  ;;  %v911_v21 = vsel %vm905_vm0, %v780_v6, 0.0  ;;  %551 = vmatmul.f32.gmra.mxu3 %v155_v48  ;;  %v722_v58 = vld [vmem:[%s2428_s3 + $0x48] sm:$0xff] }
  0xe1   :  { %v1260_v54 = vpop.eup %1259  ;;  %v415_v56 = vadd.f32 %v414_v53, %v1610_v13  ;;  %v910_v26 = vadd.f32 %v909_v16, %v908_v19 }
  0xe2   :  { %v847_v62 = vmul.f32 %v1260_v54, %v719_v55  ;;  %v225_v63 = vpop.f32.mrf.mxu0  ;;  %v1262_v1 = vpop.eup %1261 }
  0xe3   :  { %1269 = vtanh.f32 %v415_v56  ;;  %v226_v3 = vadd.f32 %v225_v63, %v1610_v13  ;;  %v1264_v9 = vpop.eup %1263  ;;  %v781_v17 = vmul.f32 %v1262_v1, %v1660_v10  ;;  %v64_v1 = vld [vmem:[#allocation4 + $0xd0] sm:$0xff] }
  0xe4   :  { %v1050_v7 = vsel %vm905_vm0, %v847_v62, 0.0  ;;  %v1266_v18 = vpop.eup %1265  ;;  %v782_v22 = vmul.f32 %v1264_v9, %v1681_v23  ;;  %v912_v23 = vadd.f32 %v911_v21, %v910_v26  ;;  %v1734_v62 = vpop.f32.mrf.mxu3 }
  0xe5   :  { %v1051_v46 = vadd.f32 %v1050_v7, %v1049_v43  ;;  %1271 = vtanh.f32 %v226_v3  ;;  %272 = vmatmul.f32.gmra.mxu0 %v62_v0  ;;  %464 = vmatmul.f32.gmra.mxu2 %v126_v33  ;;  %v1268_v59 = vpop.eup %1267  ;;  %v913_v10 = vsel %vm905_vm0, %v781_v17, 0.0  ;;  %v783_v30 = vmul.f32 %v1266_v18, %v719_v55  ;;  %v128_v3 = vld [vmem:[#allocation4 + $0x2d0] sm:$0xff]  ;;  %v1738_v28 = vpop.f32.mrf.mxu1 }
  0xe6   :  { %v915_v41 = vsel %vm905_vm0, %v782_v22, 0.0  ;;  %v784_v42 = vmul.f32 %v1268_v59, %v720_v27  ;;  %v914_v45 = vadd.f32 %v913_v10, %v912_v23  ;;  %359 = vmatmul.f32.gmra.mxu1 %v91_v44  ;;  %v156_v17 = vld [vmem:[#allocation4 + $0x3b0] sm:$0xff]  ;;  %v129_v10 = vld [vmem:[#allocation4 + $0x2d8] sm:$0xff] }
  0xe7   :  { %v917_v49 = vsel %vm905_vm0, %v783_v30, 0.0  ;;  %v723_v22 = vld [vmem:[%s2428_s3 + $0x50] sm:$0xff]  ;;  %v724_v44 = vld [vmem:[%s2428_s3 + $0x58] sm:$0xff] }
  0xe8   :  { %v417_v24 = vpop.f32.mrf.mxu2  ;;  %v916_v51 = vadd.f32 %v915_v41, %v914_v45  ;;  %v919_v53 = vsel %vm905_vm0, %v784_v42, 0.0  ;;  %554 = vmatmul.f32.gmra.mxu3 %v156_v17 }
  0xe9   :  { %v1270_v25 = vpop.eup %1269  ;;  %v418_v29 = vadd.f32 %v417_v24, %v1610_v13 }
  0xea   :  { %v848_v8 = vmul.f32 %v1270_v25, %v720_v27  ;;  %v228_v31 = vpop.f32.mrf.mxu0  ;;  %v918_v56 = vadd.f32 %v917_v49, %v916_v51  ;;  %v130_v51 = vld [vmem:[#allocation4 + $0x2e0] sm:$0xff] }
  0xeb   :  { %v1272_v36 = vpop.eup %1271  ;;  %1273 = vtanh.f32 %v418_v29  ;;  %v229_v38 = vadd.f32 %v228_v31, %v1610_v13  ;;  %v65_v29 = vld [vmem:[#allocation4 + $0xd8] sm:$0xff] }
  0xec   :  { %v1052_v43 = vsel %vm905_vm0, %v848_v8, 0.0  ;;  %v785_v50 = vmul.f32 %v1272_v36, %v721_v37  ;;  %v920_v6 = vadd.f32 %v919_v53, %v918_v56  ;;  %v1746_v25 = vpop.f32.mrf.mxu3  ;;  %v93_v36 = vld [vmem:[#allocation4 + $0x1b8] sm:$0xff] }
  0xed   :  { %v1053_v47 = vadd.f32 %v1052_v43, %v1051_v46  ;;  %1275 = vtanh.f32 %v229_v38  ;;  %275 = vmatmul.f32.gmra.mxu0 %v63_v34  ;;  %467 = vmatmul.f32.gmra.mxu2 %v127_v35  ;;  %v1749_v31 = vpop.f32.mrf.mxu1 }
  0xee   :  { %v921_v63 = vsel %vm905_vm0, %v785_v50, 0.0  ;;  %362 = vmatmul.f32.gmra.mxu1 %v92_v11  ;;  %v66_v50 = vld [vmem:[#allocation4 + $0xe0] sm:$0xff] }
  0xef   :  { %v922_v14 = vadd.f32 %v921_v63, %v920_v6  ;;  %v158_v63 = vld [vmem:[#allocation4 + $0x3c0] sm:$0xff] }
  0xf0   :  { %v420_v54 = vpop.f32.mrf.mxu2  ;;  %v725_v6 = vld [vmem:[%s2428_s3 + $0x60] sm:$0xff] }
  0xf1   :  { %v1274_v55 = vpop.eup %1273  ;;  %v421_v60 = vadd.f32 %v420_v54, %v1610_v13 }
  0xf2   :  { %v849_v0 = vmul.f32 %v1274_v55, %v721_v37  ;;  %v231_v33 = vpop.f32.mrf.mxu0  ;;  %v157_v37 = vld [vmem:[#allocation4 + $0x3b8] sm:$0xff] }
  0xf3   :  { %v1276_v5 = vpop.eup %1275  ;;  %1277 = vtanh.f32 %v421_v60  ;;  %v232_v7 = vadd.f32 %v231_v33, %v1610_v13  ;;  %557 = vmatmul.f32.gmra.mxu3 %v157_v37  ;;  %v94_v60 = vld [vmem:[#allocation4 + $0x1c0] sm:$0xff]  ;;  %v68_v37 = vld [vmem:[#allocation4 + $0xf0] sm:$0xff] }
  0xf4   :  { %v1054_v9 = vsel %vm905_vm0, %v849_v0, 0.0  ;;  %v786_v46 = vmul.f32 %v1276_v5, %v722_v58 }
  0xf5   :  { %v1055_v16 = vadd.f32 %v1054_v9, %v1053_v47  ;;  %1279 = vtanh.f32 %v232_v7  ;;  %278 = vmatmul.f32.gmra.mxu0 %v64_v1  ;;  %470 = vmatmul.f32.gmra.mxu2 %v128_v3  ;;  %v1757_v47 = vpop.f32.mrf.mxu3  ;;  %v1760_v55 = vpop.f32.mrf.mxu1 }
  0xf6   :  { %v923_v18 = vsel %vm905_vm0, %v786_v46, 0.0  ;;  %365 = vmatmul.f32.gmra.mxu1 %v93_v36 }
  0xf7   :  { %v924_v19 = vadd.f32 %v923_v18, %v922_v14  ;;  %v67_v14 = vld [vmem:[#allocation4 + $0xe8] sm:$0xff] }
  0xf8   :  { %v423_v59 = vpop.f32.mrf.mxu2 }
  0xf9   :  { %v1278_v21 = vpop.eup %1277  ;;  %v424_v24 = vadd.f32 %v423_v59, %v1610_v13 }
  0xfa   :  { %v850_v26 = vmul.f32 %v1278_v21, %v722_v58  ;;  %v234_v27 = vpop.f32.mrf.mxu0 }
  0xfb   :  { %v1280_v30 = vpop.eup %1279  ;;  %1281 = vtanh.f32 %v424_v24  ;;  %v235_v8 = vadd.f32 %v234_v27, %v1610_v13  ;;  %560 = vmatmul.f32.gmra.mxu3 %v158_v63  ;;  %v159_v24 = vld [vmem:[#allocation4 + $0x3c8] sm:$0xff] }
  0xfc   :  { %v1056_v34 = vsel %vm905_vm0, %v850_v26, 0.0  ;;  %v787_v35 = vmul.f32 %v1280_v30, %v723_v22 }
  0xfd   :  { %v1057_v23 = vadd.f32 %v1056_v34, %v1055_v16  ;;  %1283 = vtanh.f32 %v235_v8  ;;  %281 = vmatmul.f32.gmra.mxu0 %v65_v29  ;;  %473 = vmatmul.f32.gmra.mxu2 %v129_v10  ;;  %v1768_v9 = vpop.f32.mrf.mxu3  ;;  %v131_v16 = vld [vmem:[#allocation4 + $0x2e8] sm:$0xff] }
  0xfe   :  { %v925_v38 = vsel %vm905_vm0, %v787_v35, 0.0  ;;  %368 = vmatmul.f32.gmra.mxu1 %v94_v60  ;;  %v726_v8 = vld [vmem:[%s2428_s3 + $0x68] sm:$0xff] }
  0xff   :  { %v926_v41 = vadd.f32 %v925_v38, %v924_v19  ;;  %v1771_v19 = vpop.f32.mrf.mxu1  ;;  %v132_v38 = vld [vmem:[#allocation4 + $0x2f0] sm:$0xff] }
 0x100   :  { %v426_v42 = vpop.f32.mrf.mxu2 }
 0x101   :  { %v1282_v43 = vpop.eup %1281  ;;  %v427_v45 = vadd.f32 %v426_v42, %v1610_v13 }
 0x102   :  { %v851_v48 = vmul.f32 %v1282_v43, %v723_v22  ;;  %v237_v49 = vpop.f32.mrf.mxu0  ;;  %v95_v22 = vld [vmem:[#allocation4 + $0x1c8] sm:$0xff] }
 0x103   :  { %v1284_v53 = vpop.eup %1283  ;;  %1285 = vtanh.f32 %v427_v45  ;;  %v238_v54 = vadd.f32 %v237_v49, %v1610_v13  ;;  %563 = vmatmul.f32.gmra.mxu3 %v159_v24  ;;  %v160_v49 = vld [vmem:[#allocation4 + $0x3d0] sm:$0xff]  ;;  %v728_v24 = vld [vmem:[%s2428_s3 + $0x78] sm:$0xff] }
 0x104   :  { %v1058_v56 = vsel %vm905_vm0, %v851_v48, 0.0  ;;  %v788_v58 = vmul.f32 %v1284_v53, %v724_v44  ;;  %v96_v48 = vld [vmem:[#allocation4 + $0x1d0] sm:$0xff] }
 0x105   :  { %v1059_v0 = vadd.f32 %v1058_v56, %v1057_v23  ;;  %1287 = vtanh.f32 %v238_v54  ;;  %284 = vmatmul.f32.gmra.mxu0 %v66_v50  ;;  %476 = vmatmul.f32.gmra.mxu2 %v130_v51  ;;  %v1779_v35 = vpop.f32.mrf.mxu3 }
 0x106   :  { %v927_v33 = vsel %vm905_vm0, %v788_v58, 0.0  ;;  %371 = vmatmul.f32.gmra.mxu1 %v95_v22  ;;  %v727_v58 = vld [vmem:[%s2428_s3 + $0x70] sm:$0xff] }
 0x107   :  { %v928_v1 = vadd.f32 %v927_v33, %v926_v41  ;;  %v1782_v43 = vpop.f32.mrf.mxu1 }
 0x108   :  { %v429_v3 = vpop.f32.mrf.mxu2 }
 0x109   :  { %v1286_v5 = vpop.eup %1285  ;;  %v430_v7 = vadd.f32 %v429_v3, %v1610_v13  ;;  %v133_v3 = vld [vmem:[#allocation4 + $0x2f8] sm:$0xff] }
 0x10a   :  { %v852_v46 = vmul.f32 %v1286_v5, %v724_v44  ;;  %v240_v11 = vpop.f32.mrf.mxu0 }
 0x10b   :  { %v1288_v17 = vpop.eup %1287  ;;  %1289 = vtanh.f32 %v430_v7  ;;  %v241_v18 = vadd.f32 %v240_v11, %v1610_v13  ;;  %566 = vmatmul.f32.gmra.mxu3 %v160_v49  ;;  %v729_v49 = vld [vmem:[%s2428_s3 + $0x80] sm:$0xff] }
 0x10c   :  { %v1060_v59 = vsel %vm905_vm0, %v852_v46, 0.0  ;;  %v789_v21 = vmul.f32 %v1288_v17, %v725_v6 }
 0x10d   :  { %v1061_v26 = vadd.f32 %v1060_v59, %v1059_v0  ;;  %1291 = vtanh.f32 %v241_v18  ;;  %287 = vmatmul.f32.gmra.mxu0 %v67_v14  ;;  %479 = vmatmul.f32.gmra.mxu2 %v131_v16  ;;  %v1790_v63 = vpop.f32.mrf.mxu3  ;;  %v97_v14 = vld [vmem:[#allocation4 + $0x1d8] sm:$0xff] }
 0x10e   :  { %v929_v27 = vsel %vm905_vm0, %v789_v21, 0.0  ;;  %374 = vmatmul.f32.gmra.mxu1 %v96_v48  ;;  %v161_v16 = vld [vmem:[#allocation4 + $0x3d8] sm:$0xff] }
 0x10f   :  { %v930_v29 = vadd.f32 %v929_v27, %v928_v1  ;;  %v69_v1 = vld [vmem:[#allocation4 + $0xf8] sm:$0xff]  ;;  %v1793_v7 = vpop.f32.mrf.mxu1 }
 0x110   :  { %v432_v10 = vpop.f32.mrf.mxu2 }
 0x111   :  { %v1290_v30 = vpop.eup %1289  ;;  %v433_v34 = vadd.f32 %v432_v10, %v1610_v13 }
 0x112   :  { %v853_v36 = vmul.f32 %v1290_v30, %v725_v6  ;;  %v243_v23 = vpop.f32.mrf.mxu0 }
 0x113   :  { %v1292_v41 = vpop.eup %1291  ;;  %1293 = vtanh.f32 %v433_v34  ;;  %v244_v42 = vadd.f32 %v243_v23, %v1610_v13  ;;  %569 = vmatmul.f32.gmra.mxu3 %v161_v16  ;;  %v730_v16 = vld [vmem:[%s2428_s3 + $0x88] sm:$0xff] }
 0x114   :  { %v1062_v44 = vsel %vm905_vm0, %v853_v36, 0.0  ;;  %v790_v45 = vmul.f32 %v1292_v41, %v726_v8 }
 0x115   :  { %v1063_v50 = vadd.f32 %v1062_v44, %v1061_v26  ;;  %1295 = vtanh.f32 %v244_v42  ;;  %290 = vmatmul.f32.gmra.mxu0 %v68_v37  ;;  %482 = vmatmul.f32.gmra.mxu2 %v132_v38  ;;  %v1801_v27 = vpop.f32.mrf.mxu3  ;;  %v98_v37 = vld [vmem:[#allocation4 + $0x1e0] sm:$0xff] }
 0x116   :  { %v931_v51 = vsel %vm905_vm0, %v790_v45, 0.0  ;;  %377 = vmatmul.f32.gmra.mxu1 %v97_v14  ;;  %v162_v38 = vld [vmem:[#allocation4 + $0x3e0] sm:$0xff] }
 0x117   :  { %v932_v53 = vadd.f32 %v931_v51, %v930_v29  ;;  %v1804_v34 = vpop.f32.mrf.mxu1 }
 0x118   :  { %v435_v54 = vpop.f32.mrf.mxu2 }
 0x119   :  { %v1294_v56 = vpop.eup %1293  ;;  %v436_v60 = vadd.f32 %v435_v54, %v1610_v13 }
 0x11a   :  { %v854_v0 = vmul.f32 %v1294_v56, %v726_v8  ;;  %v246_v33 = vpop.f32.mrf.mxu0 }
 0x11b   :  { %v1296_v5 = vpop.eup %1295  ;;  %1297 = vtanh.f32 %v436_v60  ;;  %v247_v6 = vadd.f32 %v246_v33, %v1610_v13  ;;  %572 = vmatmul.f32.gmra.mxu3 %v162_v38 }
 0x11c   :  { %v1064_v46 = vsel %vm905_vm0, %v854_v0, 0.0  ;;  %v791_v11 = vmul.f32 %v1296_v5, %v727_v58 }
 0x11d   :  { %v1065_v17 = vadd.f32 %v1064_v46, %v1063_v50  ;;  %1299 = vtanh.f32 %v247_v6  ;;  %293 = vmatmul.f32.gmra.mxu0 %v69_v1  ;;  %485 = vmatmul.f32.gmra.mxu2 %v133_v3  ;;  %v1812_v51 = vpop.f32.mrf.mxu3  ;;  %v99_v1 = vld [vmem:[#allocation4 + $0x1e8] sm:$0xff] }
 0x11e   :  { %v933_v18 = vsel %vm905_vm0, %v791_v11, 0.0  ;;  %380 = vmatmul.f32.gmra.mxu1 %v98_v37  ;;  %v163_v3 = vld [vmem:[#allocation4 + $0x3e8] sm:$0xff] }
 0x11f   :  { %v934_v59 = vadd.f32 %v933_v18, %v932_v53  ;;  %v1815_v60 = vpop.f32.mrf.mxu1 }
 0x120   :  { %v438_v21 = vpop.f32.mrf.mxu2 }
 0x121   :  { %v1298_v22 = vpop.eup %1297  ;;  %v439_v26 = vadd.f32 %v438_v21, %v1610_v13 }
 0x122   :  { %v855_v29 = vmul.f32 %v1298_v22, %v727_v58  ;;  %v249_v10 = vpop.f32.mrf.mxu0 }
 0x123   :  { %v1300_v30 = vpop.eup %1299  ;;  %1301 = vtanh.f32 %v439_v26  ;;  %v250_v8 = vadd.f32 %v249_v10, %v1610_v13  ;;  %575 = vmatmul.f32.gmra.mxu3 %v163_v3 }
 0x124   :  { %v1066_v36 = vsel %vm905_vm0, %v855_v29, 0.0  ;;  %v792_v23 = vmul.f32 %v1300_v30, %v728_v24  ;;  %v100_v30 = vld [vmem:[#allocation4 + $0x1f0] sm:$0xff] }
 0x125   :  { %v1067_v41 = vadd.f32 %v1066_v36, %v1065_v17  ;;  %1303 = vtanh.f32 %v250_v8  ;;  %v1823_v18 = vpop.f32.mrf.mxu3  ;;  %v164_v8 = vld [vmem:[#allocation4 + $0x3f0] sm:$0xff] }
 0x126   :  { %v935_v42 = vsel %vm905_vm0, %v792_v23, 0.0  ;;  %383 = vmatmul.f32.gmra.mxu1 %v99_v1 }
 0x127   :  { %v936_v44 = vadd.f32 %v935_v42, %v934_v59  ;;  %v1826_v26 = vpop.f32.mrf.mxu1  ;;  %v731_v42 = vld [vmem:[%s2428_s3 + $0x90] sm:$0xff] }
 0x128   :  { %v441_v45 = vpop.f32.mrf.mxu2 }
 0x129   :  { %v1302_v48 = vpop.eup %1301  ;;  %v442_v50 = vadd.f32 %v441_v45, %v1610_v13 }
 0x12a   :  { %v856_v53 = vmul.f32 %v1302_v48, %v728_v24  ;;  %v252_v54 = vpop.f32.mrf.mxu0 }
 0x12b   :  { %v1304_v56 = vpop.eup %1303  ;;  %1305 = vtanh.f32 %v442_v50  ;;  %v253_v58 = vadd.f32 %v252_v54, %v1610_v13  ;;  %578 = vmatmul.f32.gmra.mxu3 %v164_v8 }
 0x12c   :  { %v1068_v0 = vsel %vm905_vm0, %v856_v53, 0.0  ;;  %v793_v33 = vmul.f32 %v1304_v56, %v729_v49 }
 0x12d   :  { %v1069_v5 = vadd.f32 %v1068_v0, %v1067_v41  ;;  %1307 = vtanh.f32 %v253_v58  ;;  %v1834_v45 = vpop.f32.mrf.mxu3  ;;  %v101_v0 = vld [vmem:[#allocation4 + $0x1f8] sm:$0xff] }
 0x12e   :  { %v937_v6 = vsel %vm905_vm0, %v793_v33, 0.0  ;;  %386 = vmatmul.f32.gmra.mxu1 %v100_v30  ;;  %v165_v33 = vld [vmem:[#allocation4 + $0x3f8] sm:$0xff] }
 0x12f   :  { %v938_v46 = vadd.f32 %v937_v6, %v936_v44  ;;  %v1837_v54 = vpop.f32.mrf.mxu1 }
 0x130   :  { %v444_v11 = vpop.f32.mrf.mxu2 }
 0x131   :  { %v1306_v14 = vpop.eup %1305  ;;  %v445_v17 = vadd.f32 %v444_v11, %v1610_v13  ;;  %v732_v11 = vld [vmem:[%s2428_s3 + $0x98] sm:$0xff] }
 0x132   :  { %v857_v59 = vmul.f32 %v1306_v14, %v729_v49  ;;  %v255_v21 = vpop.f32.mrf.mxu0 }
 0x133   :  { %v1308_v22 = vpop.eup %1307  ;;  %1309 = vtanh.f32 %v445_v17  ;;  %v256_v24 = vadd.f32 %v255_v21, %v1610_v13  ;;  %581 = vmatmul.f32.gmra.mxu3 %v165_v33 }
 0x134   :  { %v1070_v29 = vsel %vm905_vm0, %v857_v59, 0.0  ;;  %v794_v10 = vmul.f32 %v1308_v22, %v730_v16 }
 0x135   :  { %v1071_v36 = vadd.f32 %v1070_v29, %v1069_v5  ;;  %1311 = vtanh.f32 %v256_v24 }
 0x136   :  { %v939_v23 = vsel %vm905_vm0, %v794_v10, 0.0  ;;  %389 = vmatmul.f32.gmra.mxu1 %v101_v0 }
 0x137   :  { %v940_v37 = vadd.f32 %v939_v23, %v938_v46  ;;  %v1848_v24 = vpop.f32.mrf.mxu1 }
 0x138   :  { %v447_v38 = vpop.f32.mrf.mxu2 }
 0x139   :  { %v1310_v41 = vpop.eup %1309  ;;  %v448_v44 = vadd.f32 %v447_v38, %v1610_v13  ;;  %v733_v38 = vld [vmem:[%s2428_s3 + $0xa0] sm:$0xff] }
 0x13a   :  { %v858_v48 = vmul.f32 %v1310_v41, %v730_v16  ;;  %v258_v49 = vpop.f32.mrf.mxu0  ;;  %v1845_v16 = vpop.f32.mrf.mxu3 }
 0x13b   :  { %v1312_v50 = vpop.eup %1311  ;;  %1313 = vtanh.f32 %v448_v44  ;;  %v259_v53 = vadd.f32 %v258_v49, %v1610_v13 }
 0x13c   :  { %v1072_v56 = vsel %vm905_vm0, %v858_v48, 0.0  ;;  %v795_v58 = vmul.f32 %v1312_v50, %v731_v42 }
 0x13d   :  { %v1073_v1 = vadd.f32 %v1072_v56, %v1071_v36  ;;  %1315 = vtanh.f32 %v259_v53 }
 0x13e   :  { %v941_v3 = vsel %vm905_vm0, %v795_v58, 0.0 }
 0x13f   :  { %v942_v5 = vadd.f32 %v941_v3, %v940_v37  ;;  %v1860_v50 = vpop.f32.mrf.mxu1 }
 0x140   :  { %v450_v6 = vpop.f32.mrf.mxu2 }
 0x141   :  { %v1314_v46 = vpop.eup %1313  ;;  %v451_v14 = vadd.f32 %v450_v6, %v1610_v13 }
 0x142   :  { %v859_v17 = vmul.f32 %v1314_v46, %v731_v42  ;;  %v261_v59 = vpop.f32.mrf.mxu0  ;;  %v1856_v42 = vpop.f32.mrf.mxu3 }
 0x143   :  { %v1316_v21 = vpop.eup %1315  ;;  %1317 = vtanh.f32 %v451_v14  ;;  %v262_v22 = vadd.f32 %v261_v59, %v1610_v13 }
 0x144   :  { %v1074_v29 = vsel %vm905_vm0, %v859_v17, 0.0  ;;  %v796_v10 = vmul.f32 %v1316_v21, %v732_v11 }
 0x145   :  { %v1075_v30 = vadd.f32 %v1074_v29, %v1073_v1  ;;  %1319 = vtanh.f32 %v262_v22 }
 0x146   :  { %v943_v8 = vsel %vm905_vm0, %v796_v10, 0.0 }
 0x147   :  { %v944_v36 = vadd.f32 %v943_v8, %v942_v5 }
 0x148   :  { %v453_v23 = vpop.f32.mrf.mxu2 }
 0x149   :  { %v1318_v37 = vpop.eup %1317  ;;  %v454_v41 = vadd.f32 %v453_v23, %v1610_v13 }
 0x14a   :  { %v860_v44 = vmul.f32 %v1318_v37, %v732_v11  ;;  %v1858_v48 = vpop.f32.mrf.mxu0  ;;  %v1868_v5 = vpop.f32.mrf.mxu3 }
 0x14b   :  { %v1320_v49 = vpop.eup %1319  ;;  %1321 = vtanh.f32 %v454_v41  ;;  %2431 = vst [vmem:[#allocation7_spill] sm:$0xff] %v1868_v5  ;;  %v1872_v11 = vpop.f32.mrf.mxu1 }
 0x14c   :  { %v1076_v53 = vsel %vm905_vm0, %v860_v44, 0.0  ;;  %v797_v56 = vmul.f32 %v1320_v49, %v733_v38  ;;  %2432 = vst [vmem:[#allocation8_spill] sm:$0xff] %v1872_v11  ;;  %v298_v44 = vadd.f32 %v1642_v52, %v1610_v13  ;;  %v496_v52 = vadd.f32 %v1684_v32, %v1610_v13 }
 0x14d   :  { %v1077_v58 = vadd.f32 %v1076_v53, %v1075_v30  ;;  %v490_v53 = vadd.f32 %v1651_v61, %v1610_v13  ;;  %v307_v61 = vadd.f32 %v1688_v39, %v1610_v13  ;;  %v313_v39 = vadd.f32 %v1724_v40, %v1610_v13 }
 0x14e   :  { %v945_v0 = vsel %vm905_vm0, %v797_v56, 0.0  ;;  %v301_v56 = vadd.f32 %v1654_v2, %v1610_v13  ;;  %1323 = vtanh.f32 %v298_v44 }
 0x14f   :  { %v1864_v33 = vadd.f32 %v945_v0, %v944_v36  ;;  %1325 = vtanh.f32 %v490_v53 }
 0x150   :  { %v1866_v1 = vpop.f32.mrf.mxu2  ;;  %1327 = vtanh.f32 %v301_v56 }
 0x151   :  { %v1322_v3 = vpop.eup %1321 }
 0x152   :  { %v861_v6 = vmul.f32 %v1322_v3, %v733_v38  ;;  %v1870_v46 = vpop.f32.mrf.mxu0  ;;  %v1879_v21 = vpop.f32.mrf.mxu3  ;;  %v493_v3 = vadd.f32 %v1663_v12, %v1610_v13  ;;  %v310_v12 = vadd.f32 %v1703_v4, %v1610_v13  ;;  %v316_v4 = vadd.f32 %v1738_v28, %v1610_v13  ;;  %v745_v28 = vld [vmem:[%s2428_s3 + $0x100] sm:$0xff] }
 0x153   :  { %2433 = vst [vmem:[#allocation9_spill] sm:$0xff] %v1879_v21  ;;  %v1883_v29 = vpop.f32.mrf.mxu1 }
 0x154   :  { %v1078_v14 = vsel %vm905_vm0, %v861_v6, 0.0  ;;  %2434 = vst [vmem:[#allocation10_spill] sm:$0xff] %v1883_v29  ;;  %v304_v6 = vadd.f32 %v1668_v20, %v1610_v13  ;;  %1329 = vtanh.f32 %v493_v3  ;;  %v502_v20 = vadd.f32 %v1717_v15, %v1610_v13  ;;  %v1324_v32 = vpop.eup %1323 }
 0x155   :  { %v1875_v17 = vadd.f32 %v1078_v14, %v1077_v58  ;;  %v499_v14 = vadd.f32 %v1698_v57, %v1610_v13  ;;  %v1326_v56 = vpop.eup %1325  ;;  %v505_v57 = vadd.f32 %v1734_v62, %v1610_v13  ;;  %v265_v62 = vadd.f32 %v1858_v48, %v1610_v13 }
 0x156   :  { %1331 = vtanh.f32 %v304_v6  ;;  %v1328_v3 = vpop.eup %1327  ;;  %v268_v48 = vadd.f32 %v1870_v46, %v1610_v13 }
 0x157   :  { %1333 = vtanh.f32 %v496_v52  ;;  %v508_v52 = vadd.f32 %v1746_v25, %v1610_v13 }
 0x158   :  { %v1877_v59 = vpop.f32.mrf.mxu2  ;;  %1335 = vtanh.f32 %v307_v61  ;;  %v319_v61 = vadd.f32 %v1749_v31, %v1610_v13  ;;  %v746_v31 = vld [vmem:[%s2428_s3 + $0x108] sm:$0xff] }
 0x159   :  { %1337 = vtanh.f32 %v499_v14 }
 0x15a   :  { %v1881_v22 = vpop.f32.mrf.mxu0  ;;  %v1887_v30 = vpop.f32.mrf.mxu3  ;;  %1339 = vtanh.f32 %v310_v12 }
 0x15b   :  { %2435 = vst [vmem:[#allocation11_spill] sm:$0xff] %v1887_v30  ;;  %v1891_v36 = vpop.f32.mrf.mxu1  ;;  %v1330_v15 = vpop.eup %1329  ;;  %1341 = vtanh.f32 %v502_v20  ;;  %v511_v20 = vadd.f32 %v1757_v47, %v1610_v13  ;;  %v322_v47 = vadd.f32 %v1760_v55, %v1610_v13  ;;  %v271_v46 = vadd.f32 %v1881_v22, %v1610_v13 }
 0x15c   :  { %2436 = vst [vmem:[#allocation12_spill] sm:$0xff] %v1891_v36  ;;  %v1332_v40 = vpop.eup %1331  ;;  %1343 = vtanh.f32 %v313_v39  ;;  %v810_v36 = vmul.f32 %v1328_v3, %v746_v31  ;;  %v874_v30 = vmul.f32 %v1330_v15, %v746_v31  ;;  %v457_v55 = vadd.f32 %v1866_v1, %v1610_v13  ;;  %v734_v31 = vld [vmem:[%s2428_s3 + $0xa8] sm:$0xff] }
 0x15d   :  { %v1334_v14 = vpop.eup %1333  ;;  %1345 = vtanh.f32 %v505_v57  ;;  %v460_v22 = vadd.f32 %v1877_v59, %v1610_v13 }
 0x15e   :  { %v1336_v12 = vpop.eup %1335  ;;  %1347 = vtanh.f32 %v316_v4  ;;  %v747_v4 = vld [vmem:[%s2428_s3 + $0x110] sm:$0xff]  ;;  %v1997_v59 = vsel %vm905_vm0, %v874_v30, 0.0  ;;  %v750_v30 = vld [vmem:[%s2428_s3 + $0x128] sm:$0xff] }
 0x15f   :  { %1349 = vtanh.f32 %v508_v52  ;;  %v748_v52 = vld [vmem:[%s2428_s3 + $0x118] sm:$0xff]  ;;  %v811_v29 = vmul.f32 %v1332_v40, %v747_v4  ;;  %v875_v21 = vmul.f32 %v1334_v14, %v747_v4  ;;  %v1994_v14 = vsel %vm905_vm0, %v810_v36, 0.0 }
 0x160   :  { %v1885_v10 = vpop.f32.mrf.mxu2  ;;  %1351 = vtanh.f32 %v319_v61 }
 0x161   :  { %1353 = vtanh.f32 %v265_v62  ;;  %v2010_v36 = vsel %vm905_vm0, %v875_v21, 0.0  ;;  %v2028_v21 = vld [vmem:[%s2428_s3 + $0x130] sm:$0xff] }
 0x162   :  { %v1889_v8 = vpop.f32.mrf.mxu0  ;;  %v1895_v37 = vpop.f32.mrf.mxu3  ;;  %1355 = vtanh.f32 %v511_v20 }
 0x163   :  { %2437 = vst [vmem:[#allocation13_spill] sm:$0xff] %v1895_v37  ;;  %v1899_v41 = vpop.f32.mrf.mxu1  ;;  %1357 = vtanh.f32 %v268_v48 }
 0x164   :  { %2438 = vst [vmem:[#allocation14_spill] sm:$0xff] %v1899_v41  ;;  %v873_v41 = vmul.f32 %v1326_v56, %v745_v28  ;;  %1359 = vtanh.f32 %v322_v47 }
 0x165   :  { %1361 = vtanh.f32 %v271_v46 }
 0x166   :  { %v1987_v1 = vsel %vm905_vm0, %v873_v41, 0.0  ;;  %1363 = vtanh.f32 %v457_v55  ;;  %v463_v41 = vadd.f32 %v1885_v10, %v1610_v13 }
 0x168   :  { %v1893_v23 = vpop.f32.mrf.mxu2 }
 0x169   :  { %v466_v47 = vadd.f32 %v1893_v23, %v1610_v13 }
 0x16a   :  { %v1897_v38 = vpop.f32.mrf.mxu0  ;;  %v1911_v0 = vpop.f32.mrf.mxu3 }
 0x16b   :  { %2439 = vst [vmem:[#allocation15_spill] sm:$0xff] %v1911_v0  ;;  %v1921_v2 = vpop.f32.mrf.mxu1  ;;  %v809_v0 = vmul.f32 %v1324_v32, %v745_v28  ;;  %v274_v32 = vadd.f32 %v1889_v8, %v1610_v13  ;;  %v812_v28 = vmul.f32 %v1336_v12, %v748_v52  ;;  %v277_v8 = vadd.f32 %v1897_v38, %v1610_v13 }
 0x16c   :  { %2440 = vst [vmem:[#allocation16_spill] sm:$0xff] %v1921_v2  ;;  %v2007_v38 = vsel %vm905_vm0, %v811_v29, 0.0 }
 0x16d   :  { %v1984_v15 = vsel %vm905_vm0, %v809_v0, 0.0  ;;  %v749_v0 = vld [vmem:[%s2428_s3 + $0x120] sm:$0xff]  ;;  %1365 = vtanh.f32 %v274_v32  ;;  %v2023_v29 = vsel %vm905_vm0, %v812_v28, 0.0  ;;  %v735_v28 = vld [vmem:[%s2428_s3 + $0xb0] sm:$0xff] }
 0x16e   :  { %1367 = vtanh.f32 %v460_v22 }
 0x170   :  { %v1903_v49 = vpop.f32.mrf.mxu2 }
 0x171   :  { %v469_v23 = vadd.f32 %v1903_v49, %v1610_v13 }
 0x172   :  { %v1909_v58 = vpop.f32.mrf.mxu0  ;;  %v1939_v6 = vpop.f32.mrf.mxu3 }
 0x173   :  { %2441 = vst [vmem:[#allocation17_spill] sm:$0xff] %v1939_v6  ;;  %v1954_v39 = vpop.f32.mrf.mxu1  ;;  %v1338_v6 = vpop.eup %1337  ;;  %v280_v10 = vadd.f32 %v1909_v58, %v1610_v13  ;;  %1369 = vtanh.f32 %v277_v8 }
 0x174   :  { %2442 = vst [vmem:[#allocation18_spill] sm:$0xff] %v1954_v39  ;;  %v1340_v57 = vpop.eup %1339  ;;  %v876_v4 = vmul.f32 %v1338_v6, %v748_v52  ;;  %1371 = vtanh.f32 %v463_v41 }
 0x175   :  { %v1342_v39 = vpop.eup %1341  ;;  %v813_v58 = vmul.f32 %v1340_v57, %v749_v0  ;;  %v736_v57 = vld [vmem:[%s2428_s3 + $0xb8] sm:$0xff]  ;;  %1373 = vtanh.f32 %v280_v10 }
 0x176   :  { %v1344_v37 = vpop.eup %1343  ;;  %1375 = vtanh.f32 %v466_v47 }
 0x177   :  { %v1346_v61 = vpop.eup %1345  ;;  %v814_v22 = vmul.f32 %v1344_v37, %v750_v30  ;;  %v2050_v37 = vsel %vm905_vm0, %v876_v4, 0.0 }
 0x178   :  { %v1927_v44 = vpop.f32.mrf.mxu2  ;;  %v1348_v56 = vpop.eup %1347  ;;  %v878_v5 = vmul.f32 %v1346_v61, %v750_v30  ;;  %2445 = vst [vmem:[#allocation21_spill] sm:$0xff] %v2050_v37 }
 0x179   :  { %v1981_v3 = vpop.eup %1349  ;;  %v472_v49 = vadd.f32 %v1927_v44, %v1610_v13 }
 0x17a   :  { %v1933_v53 = vpop.f32.mrf.mxu0  ;;  %v1979_v62 = vpop.f32.mrf.mxu3 }
 0x17b   :  { %2443 = vst [vmem:[#allocation19_spill] sm:$0xff] %v1979_v62  ;;  %v1991_v40 = vpop.eup %1351  ;;  %v2032_v55 = vpop.f32.mrf.mxu1  ;;  %v877_v62 = vmul.f32 %v1342_v39, %v749_v0  ;;  %v283_v6 = vadd.f32 %v1933_v53, %v1610_v13  ;;  %v815_v39 = vmul.f32 %v1348_v56, %v2028_v21  ;;  %v2055_v56 = vsel %vm905_vm0, %v813_v58, 0.0 }
 0x17c   :  { %v1354_v20 = vpop.eup %1353  ;;  %2444 = vst [vmem:[#allocation20_spill] sm:$0xff] %v2032_v55  ;;  %v2070_v58 = vsel %vm905_vm0, %v814_v22, 0.0 }
 0x17d   :  { %v2020_v48 = vpop.eup %1355  ;;  %v798_v11 = vmul.f32 %v1354_v20, %v734_v31  ;;  %v2058_v41 = vsel %vm905_vm0, %v877_v62, 0.0  ;;  %1377 = vtanh.f32 %v283_v6 }
 0x17e   :  { %v1358_v32 = vpop.eup %1357  ;;  %2446 = vst [vmem:[#allocation22_spill] sm:$0xff] %v2058_v41  ;;  %1379 = vtanh.f32 %v469_v23  ;;  %v2073_v41 = vsel %vm905_vm0, %v878_v5, 0.0  ;;  %v739_v5 = vld [vmem:[%s2428_s3 + $0xd0] sm:$0xff] }
 0x17f   :  { %v2039_v52 = vpop.eup %1359  ;;  %v799_v0 = vmul.f32 %v1358_v32, %v735_v28  ;;  %v947_v10 = vsel %vm905_vm0, %v798_v11, 0.0  ;;  %2448 = vst [vmem:[#allocation24_spill] sm:$0xff] %v2073_v41  ;;  %v738_v11 = vld [vmem:[%s2428_s3 + $0xc8] sm:$0xff] }
 0x180   :  { %v1952_v25 = vpop.f32.mrf.mxu2  ;;  %v1362_v55 = vpop.eup %1361  ;;  %v948_v37 = vadd.f32 %v947_v10, %v1864_v33  ;;  %v2094_v33 = vmul.f32 %v1981_v3, %v2028_v21  ;;  %v514_v3 = vadd.f32 %v1768_v9, %v1610_v13  ;;  %v325_v21 = vadd.f32 %v1771_v19, %v1610_v13  ;;  %v742_v19 = vld [vmem:[%s2428_s3 + $0xe8] sm:$0xff] }
 0x181   :  { %v1364_v8 = vpop.eup %1363  ;;  %v800_v4 = vmul.f32 %v1362_v55, %v736_v57  ;;  %v475_v44 = vadd.f32 %v1952_v25, %v1610_v13  ;;  %v949_v6 = vsel %vm905_vm0, %v799_v0, 0.0 }
 0x182   :  { %v1966_v2 = vpop.f32.mrf.mxu0  ;;  %v1366_v61 = vpop.eup %1365  ;;  %v862_v25 = vmul.f32 %v1364_v8, %v734_v31  ;;  %v950_v10 = vadd.f32 %v949_v6, %v948_v37 }
 0x183   :  { %v286_v53 = vadd.f32 %v1966_v2, %v1610_v13  ;;  %v737_v2 = vld [vmem:[%s2428_s3 + $0xc0] sm:$0xff]  ;;  %v1368_v30 = vpop.eup %1367  ;;  %v2067_v32 = vpop.f32.mrf.mxu3  ;;  %v951_v8 = vsel %vm905_vm0, %v800_v4, 0.0 }
 0x184   :  { %2447 = vst [vmem:[#allocation23_spill] sm:$0xff] %v2067_v32  ;;  %v1370_v62 = vpop.eup %1369  ;;  %v801_v23 = vmul.f32 %v1366_v61, %v737_v2  ;;  %v863_v31 = vmul.f32 %v1368_v30, %v735_v28  ;;  %v1080_v30 = vsel %vm905_vm0, %v862_v25, 0.0  ;;  %v952_v37 = vadd.f32 %v951_v8, %v950_v10 }
 0x185   :  { %1381 = vtanh.f32 %v286_v53  ;;  %v1372_v55 = vpop.eup %1371  ;;  %v802_v0 = vmul.f32 %v1370_v62, %v738_v11  ;;  %v1081_v9 = vadd.f32 %v1080_v30, %v1875_v17 }
 0x186   :  { %1383 = vtanh.f32 %v472_v49  ;;  %v1374_v22 = vpop.eup %1373  ;;  %v2090_v49 = vpop.f32.mrf.mxu1  ;;  %v864_v4 = vmul.f32 %v1372_v55, %v736_v57  ;;  %v1082_v25 = vsel %vm905_vm0, %v863_v31, 0.0 }
 0x187   :  { %v1376_v41 = vpop.eup %1375  ;;  %2450 = vst [vmem:[#allocation26_spill] sm:$0xff] %v2090_v49  ;;  %v955_v55 = vsel %vm905_vm0, %v802_v0, 0.0  ;;  %v1083_v17 = vadd.f32 %v1082_v25, %v1081_v9 }
 0x188   :  { %v2004_v12 = vpop.f32.mrf.mxu2  ;;  %v1378_v61 = vpop.eup %1377  ;;  %v865_v57 = vmul.f32 %v1376_v41, %v737_v2  ;;  %v1084_v10 = vsel %vm905_vm0, %v864_v4, 0.0 }
 0x189   :  { %v1380_v28 = vpop.eup %1379  ;;  %v1085_v25 = vadd.f32 %v1084_v10, %v1083_v17 }
 0x18a   :  { %v288_v46 = vpop.f32.mrf.mxu0  ;;  %v866_v31 = vmul.f32 %v1380_v28, %v738_v11  ;;  %v752_v11 = vld [vmem:[%s2428_s3 + $0x138] sm:$0xff]  ;;  %v1086_v28 = vsel %vm905_vm0, %v865_v57, 0.0 }
 0x18b   :  { %v289_v20 = vadd.f32 %v288_v46, %v1610_v13  ;;  %v2076_v46 = vsel %vm905_vm0, %v815_v39, 0.0  ;;  %v478_v39 = vadd.f32 %v2004_v12, %v1610_v13  ;;  %v740_v12 = vld [vmem:[%s2428_s3 + $0xd8] sm:$0xff]  ;;  %v1382_v62 = vpop.eup %1381 }
 0x18c   :  { %2449 = vst [vmem:[#allocation25_spill] sm:$0xff] %v2076_v46  ;;  %v1384_v6 = vpop.eup %1383 }
 0x18d   :  { %1385 = vtanh.f32 %v289_v20  ;;  %v867_v4 = vmul.f32 %v1384_v6, %v739_v5  ;;  %v1087_v6 = vadd.f32 %v1086_v28, %v1085_v25  ;;  %v331_v25 = vadd.f32 %v1793_v7, %v1610_v13 }
 0x18e   :  { %1387 = vtanh.f32 %v475_v44  ;;  %v953_v44 = vsel %vm905_vm0, %v801_v23, 0.0  ;;  %v804_v23 = vmul.f32 %v1378_v61, %v740_v12  ;;  %v2118_v61 = vpop.f32.mrf.mxu3  ;;  %v523_v7 = vadd.f32 %v1801_v27, %v1610_v13 }
 0x18f   :  { %v954_v49 = vadd.f32 %v953_v44, %v952_v37  ;;  %2451 = vst [vmem:[#allocation27_spill] sm:$0xff] %v2118_v61  ;;  %v743_v44 = vld [vmem:[%s2428_s3 + $0xf0] sm:$0xff]  ;;  %v2133_v61 = vpop.f32.mrf.mxu1 }
 0x190   :  { %v480_v47 = vpop.f32.mrf.mxu2 }
 0x191   :  { %v481_v20 = vadd.f32 %v480_v47, %v1610_v13  ;;  %v741_v47 = vld [vmem:[%s2428_s3 + $0xe0] sm:$0xff]  ;;  %v956_v30 = vadd.f32 %v955_v55, %v954_v49  ;;  %v517_v49 = vadd.f32 %v1779_v35, %v1610_v13  ;;  %v1090_v35 = vsel %vm905_vm0, %v867_v4, 0.0 }
 0x192   :  { %v291_v32 = vpop.f32.mrf.mxu0  ;;  %v805_v2 = vmul.f32 %v1382_v62, %v741_v47  ;;  %v880_v4 = vmul.f32 %v2020_v48, %v752_v11 }
 0x193   :  { %v292_v53 = vadd.f32 %v291_v32, %v1610_v13  ;;  %v803_v32 = vmul.f32 %v1374_v22, %v739_v5  ;;  %v816_v5 = vmul.f32 %v1991_v40, %v752_v11  ;;  %v744_v40 = vld [vmem:[%s2428_s3 + $0xf8] sm:$0xff] }
 0x195   :  { %1389 = vtanh.f32 %v292_v53  ;;  %v1386_v53 = vpop.eup %1385  ;;  %v957_v41 = vsel %vm905_vm0, %v803_v32, 0.0  ;;  %v959_v32 = vsel %vm905_vm0, %v804_v23, 0.0 }
 0x196   :  { %1391 = vtanh.f32 %v478_v39  ;;  %v1388_v39 = vpop.eup %1387  ;;  %v806_v62 = vmul.f32 %v1386_v53, %v742_v19  ;;  %v958_v55 = vadd.f32 %v957_v41, %v956_v30  ;;  %v753_v30 = vld [vmem:[%s2428_s3 + $0x140] sm:$0xff] }
 0x197   :  { %1393 = vtanh.f32 %v481_v20  ;;  %v868_v9 = vmul.f32 %v1388_v39, %v740_v12  ;;  %v328_v12 = vadd.f32 %v1782_v43, %v1610_v13  ;;  %v520_v43 = vadd.f32 %v1790_v63, %v1610_v13 }
 0x198   :  { %v483_v22 = vpop.f32.mrf.mxu2  ;;  %v960_v23 = vadd.f32 %v959_v32, %v958_v55  ;;  %v963_v10 = vsel %vm905_vm0, %v806_v62, 0.0  ;;  %v2159_v63 = vsel %vm905_vm0, %v2094_v33, 0.0  ;;  %v817_v48 = vmul.f32 %v2039_v52, %v753_v30 }
 0x199   :  { %v484_v8 = vadd.f32 %v483_v22, %v1610_v13  ;;  %v1088_v22 = vsel %vm905_vm0, %v866_v31, 0.0  ;;  %v2170_v33 = vsel %vm905_vm0, %v816_v5, 0.0  ;;  %v2173_v52 = vsel %vm905_vm0, %v880_v4, 0.0 }
 0x19a   :  { %v294_v0 = vpop.f32.mrf.mxu0  ;;  %v532_v4 = vadd.f32 %v1834_v45, %v1610_v13  ;;  %v535_v45 = vadd.f32 %v1845_v16, %v1610_v13 }
 0x19b   :  { %v1390_v46 = vpop.eup %1389  ;;  %1395 = vtanh.f32 %v484_v8  ;;  %v295_v20 = vadd.f32 %v294_v0, %v1610_v13  ;;  %v961_v8 = vsel %vm905_vm0, %v805_v2, 0.0 }
 0x19c   :  { %v1392_v37 = vpop.eup %1391  ;;  %v807_v0 = vmul.f32 %v1390_v46, %v743_v44  ;;  %v1089_v46 = vadd.f32 %v1088_v22, %v1087_v6  ;;  %v962_v39 = vadd.f32 %v961_v8, %v960_v23  ;;  %v754_v8 = vld [vmem:[%s2428_s3 + $0x148] sm:$0xff] }
 0x19d   :  { %1397 = vtanh.f32 %v295_v20  ;;  %v1394_v57 = vpop.eup %1393  ;;  %v869_v53 = vmul.f32 %v1392_v37, %v741_v47 }
 0x19e   :  { %1399 = vtanh.f32 %v514_v3  ;;  %v870_v2 = vmul.f32 %v1394_v57, %v742_v19  ;;  %v965_v47 = vsel %vm905_vm0, %v807_v0, 0.0  ;;  %v1091_v20 = vadd.f32 %v1090_v35, %v1089_v46  ;;  %v2153_v19 = vpop.f32.mrf.mxu3 }
 0x19f   :  { %1401 = vtanh.f32 %v325_v21  ;;  %v1092_v21 = vsel %vm905_vm0, %v868_v9, 0.0  ;;  %v964_v28 = vadd.f32 %v963_v10, %v962_v39  ;;  %v1094_v32 = vsel %vm905_vm0, %v869_v53, 0.0  ;;  %v2176_v53 = vpop.f32.mrf.mxu1 }
 0x1a0   :  { %v486_v41 = vpop.f32.mrf.mxu2  ;;  %1403 = vtanh.f32 %v517_v49  ;;  %v1093_v55 = vadd.f32 %v1092_v21, %v1091_v20  ;;  %v1096_v11 = vsel %vm905_vm0, %v870_v2, 0.0  ;;  %v526_v46 = vadd.f32 %v1812_v51, %v1610_v13  ;;  %v755_v21 = vld [vmem:[%s2428_s3 + $0x150] sm:$0xff] }
 0x1a1   :  { %v1396_v31 = vpop.eup %1395  ;;  %v487_v3 = vadd.f32 %v486_v41, %v1610_v13  ;;  %v966_v22 = vadd.f32 %v965_v47, %v964_v28  ;;  %v334_v41 = vadd.f32 %v1804_v34, %v1610_v13  ;;  %v337_v34 = vadd.f32 %v1815_v60, %v1610_v13 }
 0x1a2   :  { %v871_v62 = vmul.f32 %v1396_v31, %v743_v44  ;;  %v1095_v0 = vadd.f32 %v1094_v32, %v1093_v55  ;;  %v529_v51 = vadd.f32 %v1823_v18, %v1610_v13 }
 0x1a3   :  { %v1398_v17 = vpop.eup %1397  ;;  %1405 = vtanh.f32 %v487_v3 }
 0x1a4   :  { %v808_v37 = vmul.f32 %v1398_v17, %v744_v40  ;;  %v1400_v49 = vpop.eup %1399  ;;  %1407 = vtanh.f32 %v328_v12  ;;  %v1098_v35 = vsel %vm905_vm0, %v871_v62, 0.0  ;;  %v1097_v27 = vadd.f32 %v1096_v11, %v1095_v0  ;;  %v756_v62 = vld [vmem:[%s2428_s3 + $0x158] sm:$0xff]  ;;  %v2452_v0 = vld [vmem:[#allocation7_spill] sm:$0xff] }
 0x1a5   :  { %v1402_v9 = vpop.eup %1401  ;;  %1409 = vtanh.f32 %v520_v43  ;;  %v881_v23 = vmul.f32 %v1400_v49, %v753_v30  ;;  %v2182_v12 = vsel %vm905_vm0, %v817_v48, 0.0  ;;  %v340_v43 = vadd.f32 %v1826_v26, %v1610_v13 }
 0x1a6   :  { %v967_v44 = vsel %vm905_vm0, %v808_v37, 0.0  ;;  %v1404_v6 = vpop.eup %1403  ;;  %1411 = vtanh.f32 %v331_v25  ;;  %v818_v5 = vmul.f32 %v1402_v9, %v754_v8  ;;  %v1099_v2 = vadd.f32 %v1098_v35, %v1097_v27  ;;  %v2206_v32 = vpop.f32.mrf.mxu3  ;;  %v2454_v35 = vld [vmem:[#allocation25_spill] sm:$0xff] }
 0x1a7   :  { %v968_v57 = vadd.f32 %v967_v44, %v966_v22  ;;  %1413 = vtanh.f32 %v523_v7  ;;  %v2193_v47 = vsel %vm905_vm0, %v881_v23, 0.0  ;;  %v882_v17 = vmul.f32 %v1404_v6, %v754_v8  ;;  %v2229_v11 = vpop.f32.mrf.mxu1  ;;  %v757_v44 = vld [vmem:[%s2428_s3 + $0x160] sm:$0xff]  ;;  %v758_v23 = vld [vmem:[%s2428_s3 + $0x168] sm:$0xff] }
 0x1a8   :  { %1415 = vtanh.f32 %v334_v41  ;;  %v2202_v28 = vsel %vm905_vm0, %v818_v5, 0.0  ;;  %v343_v26 = vadd.f32 %v1837_v54, %v1610_v13  ;;  %v346_v22 = vadd.f32 %v1848_v24, %v1610_v13 }
 0x1a9   :  { %v1406_v10 = vpop.eup %1405  ;;  %v970_v31 = vadd.f32 %v1984_v15, %v968_v57  ;;  %1417 = vtanh.f32 %v526_v46  ;;  %v2216_v49 = vsel %vm905_vm0, %v882_v17, 0.0  ;;  %v538_v48 = vadd.f32 %v1856_v42, %v1610_v13  ;;  %v2456_v46 = vld [vmem:[#allocation9_spill] sm:$0xff]  ;;  %v2458_v17 = vld [vmem:[#allocation22_spill] sm:$0xff] }
 0x1aa   :  { %v872_v39 = vmul.f32 %v1406_v10, %v744_v40  ;;  %v1408_v3 = vpop.eup %1407  ;;  %1419 = vtanh.f32 %v337_v34  ;;  %v349_v24 = vadd.f32 %v1860_v50, %v1610_v13  ;;  %v541_v57 = vadd.f32 %v2452_v0, %v1610_v13  ;;  %v2453_v50 = vld [vmem:[#allocation8_spill] sm:$0xff]  ;;  %v2455_v10 = vld [vmem:[#allocation21_spill] sm:$0xff]  ;;  %v2457_v34 = vld [vmem:[#allocation10_spill] sm:$0xff] }
 0x1ab   :  { %v972_v15 = vadd.f32 %v1994_v14, %v970_v31  ;;  %v1410_v30 = vpop.eup %1409  ;;  %v819_v14 = vmul.f32 %v1408_v3, %v755_v21  ;;  %1421 = vtanh.f32 %v529_v51  ;;  %v762_v0 = vld [vmem:[%s2428_s3 + $0x188] sm:$0xff] }
 0x1ac   :  { %v1100_v40 = vsel %vm905_vm0, %v872_v39, 0.0  ;;  %v1412_v18 = vpop.eup %1411  ;;  %v883_v25 = vmul.f32 %v1410_v30, %v755_v21  ;;  %1423 = vtanh.f32 %v340_v43  ;;  %v544_v39 = vadd.f32 %v2456_v46, %v1610_v13  ;;  %v759_v21 = vld [vmem:[%s2428_s3 + $0x170] sm:$0xff] }
 0x1ad   :  { %v974_v20 = vadd.f32 %v2007_v38, %v972_v15  ;;  %v1101_v60 = vadd.f32 %v1100_v40, %v1099_v2  ;;  %v1414_v55 = vpop.eup %1413  ;;  %1425 = vtanh.f32 %v532_v4  ;;  %v355_v2 = vadd.f32 %v2457_v34, %v1610_v13  ;;  %v760_v4 = vld [vmem:[%s2428_s3 + $0x178] sm:$0xff] }
 0x1ae   :  { %v1416_v16 = vpop.eup %1415  ;;  %1427 = vtanh.f32 %v343_v26  ;;  %v2239_v7 = vsel %vm905_vm0, %v883_v25, 0.0  ;;  %v884_v42 = vmul.f32 %v1414_v55, %v756_v62  ;;  %v2460_v26 = vld [vmem:[#allocation24_spill] sm:$0xff] }
 0x1af   :  { %v976_v38 = vadd.f32 %v2023_v29, %v974_v20  ;;  %v1103_v37 = vadd.f32 %v1987_v1, %v1101_v60  ;;  %v2225_v29 = vsel %vm905_vm0, %v819_v14, 0.0  ;;  %v820_v1 = vmul.f32 %v1412_v18, %v756_v62  ;;  %v1418_v8 = vpop.eup %1417  ;;  %v2263_v60 = vpop.f32.mrf.mxu3  ;;  %v2459_v18 = vld [vmem:[#allocation11_spill] sm:$0xff] }
 0x1b0   :  { %1429 = vtanh.f32 %v535_v45  ;;  %v1420_v6 = vpop.eup %1419  ;;  %v821_v5 = vmul.f32 %v1416_v16, %v757_v44  ;;  %v2261_v30 = vsel %vm905_vm0, %v884_v42, 0.0  ;;  %v885_v43 = vmul.f32 %v1418_v8, %v757_v44  ;;  %v2282_v8 = vpop.f32.mrf.mxu1 }
 0x1b1   :  { %v978_v9 = vadd.f32 %v2055_v56, %v976_v38  ;;  %v1105_v54 = vadd.f32 %v1997_v59, %v1103_v37  ;;  %1431 = vtanh.f32 %v346_v22  ;;  %v1422_v27 = vpop.eup %1421  ;;  %v991_v31 = vsel %vm905_vm0, %v820_v1, 0.0 }
 0x1b2   :  { %1433 = vtanh.f32 %v538_v48  ;;  %v1424_v3 = vpop.eup %1423  ;;  %v822_v20 = vmul.f32 %v1420_v6, %v758_v23  ;;  %v993_v25 = vsel %vm905_vm0, %v821_v5, 0.0  ;;  %v886_v45 = vmul.f32 %v1422_v27, %v758_v23  ;;  %v2463_v27 = vld [vmem:[#allocation14_spill] sm:$0xff] }
 0x1b3   :  { %v980_v59 = vadd.f32 %v2070_v58, %v978_v9  ;;  %v1107_v56 = vadd.f32 %v2010_v36, %v1105_v54  ;;  %v352_v58 = vadd.f32 %v2453_v50, %v1610_v13  ;;  %1435 = vtanh.f32 %v349_v24  ;;  %v1426_v40 = vpop.eup %1425  ;;  %v761_v9 = vld [vmem:[%s2428_s3 + $0x180] sm:$0xff]  ;;  %v2461_v54 = vld [vmem:[#allocation12_spill] sm:$0xff] }
 0x1b4   :  { %1437 = vtanh.f32 %v541_v57  ;;  %v1428_v14 = vpop.eup %1427  ;;  %v823_v55 = vmul.f32 %v1424_v3, %v759_v21  ;;  %v358_v1 = vadd.f32 %v2461_v54, %v1610_v13  ;;  %v1126_v44 = vsel %vm905_vm0, %v885_v43, 0.0  ;;  %v2462_v57 = vld [vmem:[#allocation13_spill] sm:$0xff] }
 0x1b5   :  { %v982_v36 = vadd.f32 %v2454_v35, %v980_v59  ;;  %v1109_v41 = vadd.f32 %v2455_v10, %v1107_v56  ;;  %1439 = vtanh.f32 %v352_v58  ;;  %v995_v24 = vsel %vm905_vm0, %v822_v20, 0.0 }
 0x1b6   :  { %v1430_v37 = vpop.eup %1429  ;;  %1441 = vtanh.f32 %v544_v39  ;;  %v887_v59 = vmul.f32 %v1426_v40, %v759_v21  ;;  %v824_v56 = vmul.f32 %v1428_v14, %v760_v4  ;;  %v1128_v50 = vsel %vm905_vm0, %v886_v45, 0.0 }
 0x1b7   :  { %v984_v15 = vadd.f32 %v2170_v33, %v982_v36  ;;  %v1111_v51 = vadd.f32 %v2458_v17, %v1109_v41  ;;  %v547_v33 = vadd.f32 %v2459_v18, %v1610_v13  ;;  %v1432_v22 = vpop.eup %1431  ;;  %1443 = vtanh.f32 %v355_v2  ;;  %v763_v41 = vld [vmem:[%s2428_s3 + $0x190] sm:$0xff]  ;;  %v2464_v17 = vld [vmem:[#allocation15_spill] sm:$0xff] }
 0x1b8   :  { %v1434_v16 = vpop.eup %1433  ;;  %v997_v58 = vsel %vm905_vm0, %v823_v55, 0.0  ;;  %v888_v35 = vmul.f32 %v1430_v37, %v760_v4  ;;  %v825_v36 = vmul.f32 %v1432_v22, %v761_v9  ;;  %v361_v5 = vadd.f32 %v2463_v27, %v1610_v13  ;;  %v2309_v4 = vpop.f32.mrf.mxu3  ;;  %v765_v22 = vld [vmem:[%s2428_s3 + $0x1a0] sm:$0xff] }
 0x1b9   :  { %v986_v62 = vadd.f32 %v2182_v12, %v984_v15  ;;  %v1113_v38 = vadd.f32 %v2460_v26, %v1111_v51  ;;  %v1436_v42 = vpop.eup %1435  ;;  %1445 = vtanh.f32 %v547_v33  ;;  %v1130_v39 = vsel %vm905_vm0, %v887_v59, 0.0  ;;  %v764_v15 = vld [vmem:[%s2428_s3 + $0x198] sm:$0xff]  ;;  %v2465_v33 = vld [vmem:[#allocation16_spill] sm:$0xff] }
 0x1ba   :  { %v1438_v23 = vpop.eup %1437  ;;  %1447 = vtanh.f32 %v358_v1  ;;  %v999_v3 = vsel %vm905_vm0, %v824_v56, 0.0  ;;  %v889_v21 = vmul.f32 %v1434_v16, %v761_v9  ;;  %v826_v34 = vmul.f32 %v1436_v42, %v762_v0  ;;  %v2466_v9 = vld [vmem:[#allocation18_spill] sm:$0xff]  ;;  %v387_v56 = vpop.f32.mrf.mxu1 }
 0x1bb   :  { %v988_v48 = vadd.f32 %v2202_v28, %v986_v62  ;;  %v1115_v12 = vadd.f32 %v2159_v63, %v1113_v38  ;;  %v550_v28 = vadd.f32 %v2462_v57, %v1610_v13  ;;  %v1440_v10 = vpop.eup %1439  ;;  %v553_v51 = vadd.f32 %v2464_v17, %v1610_v13 }
 0x1bc   :  { %v1001_v43 = vsel %vm905_vm0, %v825_v36, 0.0  ;;  %v890_v20 = vmul.f32 %v1438_v23, %v762_v0  ;;  %v827_v14 = vmul.f32 %v1440_v10, %v763_v41  ;;  %v364_v62 = vadd.f32 %v2465_v33, %v1610_v13  ;;  %v766_v10 = vld [vmem:[%s2428_s3 + $0x1a8] sm:$0xff] }
 0x1bd   :  { %v990_v63 = vadd.f32 %v2225_v29, %v988_v48  ;;  %v1117_v6 = vadd.f32 %v2173_v52, %v1115_v12  ;;  %v1442_v52 = vpop.eup %1441  ;;  %1449 = vtanh.f32 %v550_v28  ;;  %v1134_v37 = vsel %vm905_vm0, %v889_v21, 0.0  ;;  %v2468_v28 = vld [vmem:[#allocation20_spill] sm:$0xff] }
 0x1be   :  { %v1444_v2 = vpop.eup %1443  ;;  %1451 = vtanh.f32 %v361_v5  ;;  %v367_v54 = vadd.f32 %v2466_v9, %v1610_v13  ;;  %v1005_v12 = vsel %vm905_vm0, %v827_v14, 0.0 }
 0x1bf   :  { %v992_v46 = vadd.f32 %v991_v31, %v990_v63  ;;  %v1119_v29 = vadd.f32 %v2193_v47, %v1117_v6  ;;  %v1132_v47 = vsel %vm905_vm0, %v888_v35, 0.0  ;;  %v1446_v18 = vpop.eup %1445  ;;  %v828_v45 = vmul.f32 %v1444_v2, %v764_v15 }
 0x1c0   :  { %v1448_v55 = vpop.eup %1447  ;;  %1453 = vtanh.f32 %v553_v51  ;;  %v892_v16 = vmul.f32 %v1446_v18, %v764_v15  ;;  %v370_v63 = vadd.f32 %v2468_v28, %v1610_v13  ;;  %v376_v15 = vadd.f32 %v2133_v61, %v1610_v13  ;;  %v2472_v51 = vld [vmem:[#allocation27_spill] sm:$0xff] }
 0x1c1   :  { %v994_v40 = vadd.f32 %v993_v25, %v992_v46  ;;  %v1121_v31 = vadd.f32 %v2216_v49, %v1119_v29  ;;  %v1003_v49 = vsel %vm905_vm0, %v826_v34, 0.0  ;;  %v891_v25 = vmul.f32 %v1442_v52, %v763_v41  ;;  %v2471_v52 = vld [vmem:[#allocation23_spill] sm:$0xff] }
 0x1c2   :  { %1455 = vtanh.f32 %v364_v62  ;;  %v829_v23 = vmul.f32 %v1448_v55, %v765_v22  ;;  %v1140_v46 = vsel %vm905_vm0, %v892_v16, 0.0  ;;  %v379_v61 = vadd.f32 %v2176_v53, %v1610_v13 }
 0x1c3   :  { %v996_v26 = vadd.f32 %v995_v24, %v994_v40  ;;  %v1123_v38 = vadd.f32 %v2239_v7, %v1121_v31  ;;  %v1136_v7 = vsel %vm905_vm0, %v890_v20, 0.0  ;;  %v2467_v24 = vld [vmem:[#allocation17_spill] sm:$0xff]  ;;  %v1450_v42 = vpop.eup %1449  ;;  %v1138_v6 = vsel %vm905_vm0, %v891_v25, 0.0  ;;  %v2345_v31 = vpop.f32.mrf.mxu3 }
 0x1c4   :  { %v556_v59 = vadd.f32 %v2467_v24, %v1610_v13  ;;  %v1452_v36 = vpop.eup %1451  ;;  %1457 = vtanh.f32 %v367_v54  ;;  %v893_v29 = vmul.f32 %v1450_v42, %v765_v22  ;;  %v1009_v17 = vsel %vm905_vm0, %v829_v23, 0.0  ;;  %v767_v20 = vld [vmem:[%s2428_s3 + $0x1b0] sm:$0xff] }
 0x1c5   :  { %v998_v1 = vadd.f32 %v997_v58, %v996_v26  ;;  %v1125_v48 = vadd.f32 %v2261_v30, %v1123_v38  ;;  %v1007_v30 = vsel %vm905_vm0, %v828_v45, 0.0  ;;  %v2469_v58 = vld [vmem:[#allocation19_spill] sm:$0xff]  ;;  %v565_v40 = vadd.f32 %v2472_v51, %v1610_v13  ;;  %v768_v38 = vld [vmem:[%s2428_s3 + $0x1b8] sm:$0xff] }
 0x1c6   :  { %v559_v35 = vadd.f32 %v2469_v58, %v1610_v13  ;;  %1459 = vtanh.f32 %v556_v59  ;;  %v1454_v21 = vpop.eup %1453  ;;  %v1142_v18 = vsel %vm905_vm0, %v893_v29, 0.0  ;;  %v568_v62 = vadd.f32 %v2153_v19, %v1610_v13  ;;  %v390_v19 = vpop.f32.mrf.mxu1  ;;  %v773_v51 = vld [vmem:[%s2428_s3 + $0x1e0] sm:$0xff] }
 0x1c7   :  { %v1000_v0 = vadd.f32 %v999_v3, %v998_v1  ;;  %v1127_v57 = vadd.f32 %v1126_v44, %v1125_v48  ;;  %v2470_v44 = vld [vmem:[#allocation26_spill] sm:$0xff]  ;;  %v562_v3 = vadd.f32 %v2471_v52, %v1610_v13  ;;  %1461 = vtanh.f32 %v370_v63 }
 0x1c8   :  { %v373_v5 = vadd.f32 %v2470_v44, %v1610_v13  ;;  %1463 = vtanh.f32 %v559_v35  ;;  %v894_v33 = vmul.f32 %v1454_v21, %v766_v10  ;;  %v385_v22 = vadd.f32 %v2282_v8, %v1610_v13 }
 0x1c9   :  { %v1002_v41 = vadd.f32 %v1001_v43, %v1000_v0  ;;  %v1129_v27 = vadd.f32 %v1128_v50, %v1127_v57  ;;  %v830_v50 = vmul.f32 %v1452_v36, %v766_v10  ;;  %v1456_v43 = vpop.eup %1455  ;;  %v388_v48 = vadd.f32 %v387_v56, %v1610_v13 }
 0x1ca   :  { %1465 = vtanh.f32 %v373_v5  ;;  %v1458_v26 = vpop.eup %1457  ;;  %v831_v55 = vmul.f32 %v1456_v43, %v767_v20  ;;  %v571_v24 = vadd.f32 %v2206_v32, %v1610_v13  ;;  %v391_v0 = vadd.f32 %v390_v19, %v1610_v13  ;;  %v771_v32 = vld [vmem:[%s2428_s3 + $0x1d0] sm:$0xff] }
 0x1cb   :  { %v1004_v34 = vadd.f32 %v1003_v49, %v1002_v41  ;;  %v1131_v2 = vadd.f32 %v1130_v39, %v1129_v27  ;;  %1467 = vtanh.f32 %v562_v3  ;;  %v1011_v53 = vsel %vm905_vm0, %v830_v50, 0.0  ;;  %v582_v27 = vpop.f32.mrf.mxu3 }
 0x1cc   :  { %1469 = vtanh.f32 %v376_v15  ;;  %v1460_v45 = vpop.eup %1459  ;;  %v832_v16 = vmul.f32 %v1458_v26, %v768_v38  ;;  %v1013_v56 = vsel %vm905_vm0, %v831_v55, 0.0  ;;  %v577_v52 = vadd.f32 %v2309_v4, %v1610_v13  ;;  %v776_v55 = vld [vmem:[%s2428_s3 + $0x1f8] sm:$0xff] }
 0x1cd   :  { %v1006_v14 = vadd.f32 %v1005_v12, %v1004_v34  ;;  %v1133_v39 = vadd.f32 %v1132_v47, %v1131_v2  ;;  %v382_v47 = vadd.f32 %v2229_v11, %v1610_v13  ;;  %1471 = vtanh.f32 %v565_v40  ;;  %v1462_v9 = vpop.eup %1461 }
 0x1ce   :  { %1473 = vtanh.f32 %v379_v61  ;;  %v1464_v11 = vpop.eup %1463  ;;  %v1144_v12 = vsel %vm905_vm0, %v894_v33, 0.0  ;;  %v895_v28 = vmul.f32 %v1460_v45, %v767_v20  ;;  %v1015_v36 = vsel %vm905_vm0, %v832_v16, 0.0  ;;  %v774_v33 = vld [vmem:[%s2428_s3 + $0x1e8] sm:$0xff] }
 0x1cf   :  { %v1008_v49 = vadd.f32 %v1007_v30, %v1006_v14  ;;  %v1135_v25 = vadd.f32 %v1134_v37, %v1133_v39  ;;  %v769_v37 = vld [vmem:[%s2428_s3 + $0x1c0] sm:$0xff]  ;;  %1475 = vtanh.f32 %v568_v62  ;;  %v896_v10 = vmul.f32 %v1464_v11, %v768_v38 }
 0x1d0   :  { %v1466_v8 = vpop.eup %1465  ;;  %1477 = vtanh.f32 %v382_v47  ;;  %v833_v63 = vmul.f32 %v1462_v9, %v769_v37  ;;  %v580_v2 = vadd.f32 %v2345_v31, %v1610_v13  ;;  %v583_v40 = vadd.f32 %v582_v27, %v1610_v13 }
 0x1d1   :  { %v1010_v54 = vadd.f32 %v1009_v17, %v1008_v49  ;;  %v1137_v1 = vadd.f32 %v1136_v7, %v1135_v25  ;;  %v770_v7 = vld [vmem:[%s2428_s3 + $0x1c8] sm:$0xff]  ;;  %v1468_v57 = vpop.eup %1467  ;;  %1479 = vtanh.f32 %v385_v22  ;;  %v1146_v43 = vsel %vm905_vm0, %v895_v28, 0.0 }
 0x1d2   :  { %v1470_v30 = vpop.eup %1469  ;;  %1481 = vtanh.f32 %v388_v48  ;;  %v834_v41 = vmul.f32 %v1466_v8, %v770_v7  ;;  %v1017_v3 = vsel %vm905_vm0, %v833_v63, 0.0  ;;  %v897_v21 = vmul.f32 %v1468_v57, %v769_v37 }
 0x1d3   :  { %v1012_v59 = vadd.f32 %v1011_v53, %v1010_v54  ;;  %v1139_v42 = vadd.f32 %v1138_v6, %v1137_v1  ;;  %v574_v6 = vadd.f32 %v2263_v60, %v1610_v13  ;;  %v1472_v35 = vpop.eup %1471  ;;  %1483 = vtanh.f32 %v571_v24  ;;  %v775_v13 = vld [vmem:[%s2428_s3 + $0x1f0] sm:$0xff] }
 0x1d4   :  { %v1474_v44 = vpop.eup %1473  ;;  %1485 = vtanh.f32 %v391_v0  ;;  %v835_v34 = vmul.f32 %v1470_v30, %v771_v32  ;;  %v1019_v20 = vsel %vm905_vm0, %v834_v41, 0.0  ;;  %v1148_v31 = vsel %vm905_vm0, %v896_v10, 0.0 }
 0x1d5   :  { %v1014_v23 = vadd.f32 %v1013_v56, %v1012_v59  ;;  %v1141_v58 = vadd.f32 %v1140_v46, %v1139_v42  ;;  %v772_v46 = vld [vmem:[%s2428_s3 + $0x1d8] sm:$0xff]  ;;  %v1476_v60 = vpop.eup %1475  ;;  %1487 = vtanh.f32 %v574_v6  ;;  %v898_v26 = vmul.f32 %v1472_v35, %v770_v7 }
 0x1d6   :  { %v1478_v15 = vpop.eup %1477  ;;  %v836_v14 = vmul.f32 %v1474_v44, %v772_v46  ;;  %1489 = vtanh.f32 %v577_v52  ;;  %v1021_v38 = vsel %vm905_vm0, %v835_v34, 0.0  ;;  %v1150_v45 = vsel %vm905_vm0, %v897_v21, 0.0 }
 0x1d7   :  { %v1016_v5 = vadd.f32 %v1015_v36, %v1014_v23  ;;  %v1143_v29 = vadd.f32 %v1142_v18, %v1141_v58  ;;  %v1480_v4 = vpop.eup %1479  ;;  %v837_v49 = vmul.f32 %v1478_v15, %v773_v51  ;;  %1491 = vtanh.f32 %v580_v2 }
 0x1d8   :  { %v1482_v39 = vpop.eup %1481  ;;  %1493 = vtanh.f32 %v583_v40  ;;  %v899_v22 = vmul.f32 %v1476_v60, %v771_v32  ;;  %v1023_v19 = vsel %vm905_vm0, %v836_v14, 0.0  ;;  %v838_v9 = vmul.f32 %v1480_v4, %v774_v33 }
 0x1d9   :  { %v1145_v17 = vadd.f32 %v1144_v12, %v1143_v29  ;;  %v1018_v50 = vadd.f32 %v1017_v3, %v1016_v5  ;;  %v1484_v62 = vpop.eup %1483  ;;  %v839_v54 = vmul.f32 %v1482_v39, %v775_v13  ;;  %v1152_v11 = vsel %vm905_vm0, %v898_v26, 0.0 }
 0x1da   :  { %v1486_v25 = vpop.eup %1485  ;;  %v900_v12 = vmul.f32 %v1484_v62, %v772_v46  ;;  %v1025_v16 = vsel %vm905_vm0, %v837_v49, 0.0  ;;  %v1154_v0 = vsel %vm905_vm0, %v899_v22, 0.0  ;;  %v1027_v56 = vsel %vm905_vm0, %v838_v9, 0.0 }
 0x1db   :  { %v1147_v61 = vadd.f32 %v1146_v43, %v1145_v17  ;;  %v1020_v18 = vadd.f32 %v1019_v20, %v1018_v50  ;;  %v1488_v1 = vpop.eup %1487  ;;  %v840_v24 = vmul.f32 %v1486_v25, %v776_v55  ;;  %v1029_v28 = vsel %vm905_vm0, %v839_v54, 0.0 }
 0x1dc   :  { %v1490_v8 = vpop.eup %1489  ;;  %v901_v57 = vmul.f32 %v1488_v1, %v773_v51  ;;  %v1156_v58 = vsel %vm905_vm0, %v900_v12, 0.0  ;;  %v1173_v39 = vstv %s2429_s4 }
 0x1dd   :  { %v1149_v47 = vadd.f32 %v1148_v31, %v1147_v61  ;;  %v1022_v53 = vadd.f32 %v1021_v38, %v1020_v18  ;;  %v1492_v7 = vpop.eup %1491  ;;  %v902_v32 = vmul.f32 %v1490_v8, %v774_v33  ;;  %v1031_v6 = vsel %vm905_vm0, %v840_v24, 0.0 }
 0x1de   :  { %v1494_v63 = vpop.eup %1493  ;;  %v1158_v10 = vsel %vm905_vm0, %v901_v57, 0.0  ;;  %v903_v41 = vmul.f32 %v1492_v7, %v775_v13 }
 0x1df   :  { %v1151_v37 = vadd.f32 %v1150_v45, %v1149_v47  ;;  %v1024_v48 = vadd.f32 %v1023_v19, %v1022_v53  ;;  %v904_v27 = vmul.f32 %v1494_v63, %v776_v55  ;;  %v1160_v29 = vsel %vm905_vm0, %v902_v32, 0.0 }
 0x1e0   :  { %v1162_v60 = vsel %vm905_vm0, %v903_v41, 0.0 }
 0x1e1   :  { %v1153_v59 = vadd.f32 %v1152_v11, %v1151_v37  ;;  %v1026_v42 = vadd.f32 %v1025_v16, %v1024_v48  ;;  %v1164_v3 = vsel %vm905_vm0, %v904_v27, 0.0 }
 0x1e3   :  { %v1155_v30 = vadd.f32 %v1154_v0, %v1153_v59  ;;  %v1028_v23 = vadd.f32 %v1027_v56, %v1026_v42 }
 0x1e5   :  { %v1157_v35 = vadd.f32 %v1156_v58, %v1155_v30  ;;  %v1030_v36 = vadd.f32 %v1029_v28, %v1028_v23 }
 0x1e7   :  { %v1159_v44 = vadd.f32 %v1158_v10, %v1157_v35  ;;  %v1032_v5 = vadd.f32 %v1031_v6, %v1030_v36 }
 0x1e9   :  { %v1161_v46 = vadd.f32 %v1160_v29, %v1159_v44  ;;  %v1033_v52 = vrot.slane %v1032_v5, 4 }
 0x1eb   :  { %v1163_v21 = vadd.f32 %v1162_v60, %v1161_v46  ;;  %v1034_v34 = vadd.f32 %v1033_v52, %v1032_v5 }
 0x1ed   :  { %v1035_v2 = vrot.slane %v1034_v34, 2  ;;  %v1165_v15 = vadd.f32 %v1164_v3, %v1163_v21 }
 0x1ef   :  { %v1036_v17 = vadd.f32 %v1035_v2, %v1034_v34  ;;  %v1166_v50 = vrot.slane %v1165_v15, 4 }
 0x1f1   :  { %v1167_v51 = vadd.f32 %v1166_v50, %v1165_v15  ;;  %v1037_v40 = vrot.slane %v1036_v17, 1 }
 0x1f3   :  { %v1168_v4 = vrot.slane %v1167_v51, 2  ;;  %v1038_v20 = vadd.f32 %v1037_v40, %v1036_v17 }
 0x1f5   :  { %v1169_v43 = vadd.f32 %v1168_v4, %v1167_v51  ;;  %v1174_v31 = vadd.f32 %v1173_v39, %v1038_v20 }
 0x1f7   :  { %v1170_v14 = vrot.slane %v1169_v43, 1 }
 0x1f9   :  { %v1171_v61 = vadd.f32 %v1170_v14, %v1169_v43 }
 0x1fb   :  { %v1175_v18 = vadd.f32 %v1173_v39, %v1171_v61 }
 0x1fd   :  { %v1179_v33 = vsel %vm1178_vm1, %v1175_v18, %v1174_v31 }
 0x1fe   :  { %1182 = vst.msk [vmem:[%s2430_s5] sm:$0x3] %vm1181_vm2, %v1179_v33 }
 0x1ff   :  { %1187 = vsyncpa [#allocation5], 1 }

</bundles_post_ra>
